<compile_context>
chip_gen: v5e
topology: v5e:2x2
jax: 0.10.0
libtpu: 0.0.40
codegen_flags: <defaults>
</compile_context>

<pallas_src>
import functools

import jax
import jax.numpy as jnp
from jax.experimental import pallas as pl
from jax.experimental.pallas import tpu as pltpu


def _round_up(n, m):
    return (n + m - 1) // m * m


def _ae_kernel(n_enc, n_dec, sigmoid, x_ref, *refs):
    """refs = (enc_w0, enc_b0, ..., dec_w0, dec_b0, ..., out_ref, z_ref)."""
    enc_refs = refs[:2 * n_enc]
    dec_refs = refs[2 * n_enc:2 * (n_enc + n_dec)]
    out_ref = refs[-2]
    z_ref = refs[-1]

    h = x_ref[...]  # (TB, in_pad) f32

    def layer(h, w_ref, b_ref, relu):
        w = w_ref[...]                       # (in_pad, out_pad) f32 or bf16
        b = b_ref[...]                       # (1, out_pad) f32
        # Feed the MXU matched-dtype operands (bf16 x bf16 hits native rate);
        # accumulate in f32.  Bias / activation stay in f32 (v5e VPU: no bf16).
        lhs = h if h.dtype == w.dtype else h.astype(w.dtype)
        h = jnp.dot(lhs, w, preferred_element_type=jnp.float32) + b
        if relu:
            h = jnp.maximum(h, 0.0)
        return h

    # ---- encoder: LinearBlock (Linear+ReLU) x (n_enc-1), then plain Linear ----
    for i in range(n_enc):
        h = layer(h, enc_refs[2 * i], enc_refs[2 * i + 1], relu=i < n_enc - 1)
    z_ref[...] = h.astype(z_ref.dtype)

    # noise == 0 and vae == False  =>  z_decoder = z
    # ---- decoder: LinearBlock x (n_dec-1), then plain Linear (+ sigmoid) ----
    for i in range(n_dec):
        h = layer(h, dec_refs[2 * i], dec_refs[2 * i + 1], relu=i < n_dec - 1)
    if sigmoid:
        h = jax.nn.sigmoid(h)
    out_ref[...] = h.astype(out_ref.dtype)


def autoencoder_forward(x, enc_params, dec_params, sigmoid=False,
                        weight_dtype=jnp.float32, batch_tile=512,
                        feature_align=None):
    """x: (B, input_dim) f32.  enc/dec_params: list of (W(in,out), b(1,out))."""
    B, input_dim = x.shape
    z_dim = enc_params[-1][0].shape[1]
    out_dim = dec_params[-1][0].shape[1]

    # ---- choose MXU alignment: 256 only pays off for genuinely wide layers
    # (v6e/v7x 2x256^2 MXU); small layers stay at 128 to avoid wasted FLOPs.
    real_dims = ([input_dim]
                 + [w.shape[1] for w, _ in enc_params]
                 + [w.shape[1] for w, _ in dec_params])
    align = feature_align or (256 if max(real_dims) >= 192 else 128)

    # ---- pad params to lane-dense (multiples of `align`) shapes ----
    def pad_layer(w, b):
        din, dout = w.shape
        din_p, dout_p = _round_up(din, align), _round_up(dout, align)
        w_p = jnp.zeros((din_p, dout_p), weight_dtype)
        w_p = w_p.at[:din, :dout].set(w.astype(weight_dtype))
        b_p = jnp.zeros((1, dout_p), jnp.float32)
        b_p = b_p.at[:, :dout].set(b.astype(jnp.float32))
        return w_p, b_p

    enc_p = [pad_layer(w, b) for w, b in enc_params]
    dec_p = [pad_layer(w, b) for w, b in dec_params]
    all_p = enc_p + dec_p

    in_pad = enc_p[0][0].shape[0]
    z_pad = enc_p[-1][0].shape[1]
    out_pad = dec_p[-1][0].shape[1]

    # ---- batch tiling (TB multiple of 8); ensure >=2 grid steps when possible
    # so the batch grid can split across both TensorCores on v7x. ----
    TB = min(batch_tile, _round_up(B, 8))
    TB = _round_up(TB, 8)
    if _round_up(B, TB) // TB < 2 and TB > 8:
        TB = _round_up((TB + 1) // 2, 8)
    B_pad = _round_up(B, TB)
    x_p = jnp.zeros((B_pad, in_pad), jnp.float32)
    x_p = x_p.at[:B, :input_dim].set(x.astype(jnp.float32))

    flat_args = [x_p] + [a for wb in all_p for a in wb]

    out_shape = (jax.ShapeDtypeStruct((B_pad, out_pad), jnp.float32),
                 jax.ShapeDtypeStruct((B_pad, z_pad), jnp.float32))
    out_specs = (pl.BlockSpec((TB, out_pad), lambda i: (i, 0)),
                 pl.BlockSpec((TB, z_pad), lambda i: (i, 0)))

    # ---- VMEM budget from the real resident footprint, capped per-generation
    param_bytes = sum(w.size * w.dtype.itemsize + b.size * 4 for w, b in all_p)
    io_bytes = 2 * TB * (in_pad + out_pad + z_pad) * 4           # double-buffered IO
    widest = max(max(w.shape) for w, _ in all_p)
    scratch_bytes = 4 * TB * widest * 4                          # intermediates
    try:
        info = pltpu.get_tpu_info()
        vmem_cap = getattr(info, "vmem_capacity_bytes", None) or 64 * 1024 * 1024
    except Exception:
        vmem_cap = 64 * 1024 * 1024                              # v7x-safe default
    vmem_cap_target = int(0.85 * vmem_cap)

    def _vmem_limit(param_buffers):
        need = int(1.25 * (param_buffers * param_bytes + io_bytes + scratch_bytes))
        need = max(need, 8 * 1024 * 1024)                        # small headroom floor
        return min(need, vmem_cap_target)

    # ---- cost estimate for the XLA scheduler ----
    flops = 2 * B_pad * sum(w.shape[0] * w.shape[1] for w, _ in all_p)
    bytes_accessed = int(x_p.size * 4 + param_bytes
                         + B_pad * (out_pad + z_pad) * 4)
    transcendentals = B_pad * out_pad if sigmoid else 0
    cost = pl.CostEstimate(flops=int(flops),
                           transcendentals=int(transcendentals),
                           bytes_accessed=bytes_accessed)

    kernel = functools.partial(_ae_kernel, len(enc_p), len(dec_p), sigmoid)

    def _pinned_spec(shape, buffer_count):
        if buffer_count is None:
            return pl.BlockSpec(shape, lambda i: (0, 0))
        # Constant index_map: single-buffer to halve resident parameter VMEM.
        return pl.BlockSpec(shape, lambda i: (0, 0),
                            pipeline_mode=pl.Buffered(buffer_count))

    def _build(param_buffer_count, vmem_limit):
        in_specs = [pl.BlockSpec((TB, in_pad), lambda i: (i, 0))]
        for w, b in all_p:
            in_specs.append(_pinned_spec(w.shape, param_buffer_count))
            in_specs.append(_pinned_spec(b.shape, param_buffer_count))
        return pl.pallas_call(
            kernel,
            grid=(B_pad // TB,),
            out_shape=out_shape,
            in_specs=in_specs,
            out_specs=out_specs,
            compiler_params=pltpu.CompilerParams(
                dimension_semantics=("parallel",),
                vmem_limit_bytes=vmem_limit),
            cost_estimate=cost,
        )

    try:
        out_p, z_p = _build(1, _vmem_limit(1))(*flat_args)
    except Exception:
        # Fallback for Pallas versions that reject Buffered(1) on pinned specs:
        # identical semantics, default double-buffered parameter windows.
        out_p, z_p = _build(None, _vmem_limit(2))(*flat_args)

    return out_p[:B, :out_dim], z_p[:B, :z_dim]


def _init_linear(key, in_dim, out_dim):
    """Deterministic init (PyTorch-Linear-like uniform bounds)."""
    kw, kb = jax.random.split(key)
    bound = 1.0 / jnp.sqrt(jnp.float32(in_dim))
    w = jax.random.uniform(kw, (in_dim, out_dim), jnp.float32, -bound, bound)
    b = jax.random.uniform(kb, (1, out_dim), jnp.float32, -bound, bound)
    return w, b


def build_params(key, input_dim, hidden_dims, z_dim, vae=False):
    enc_dims = [input_dim] + list(hidden_dims) + [z_dim * 2 if vae else z_dim]
    dec_dims = list(reversed(enc_dims))
    dec_dims[0] = z_dim
    enc_params, dec_params = [], []
    for i in range(1, len(enc_dims)):
        key, sub = jax.random.split(key)
        enc_params.append(_init_linear(sub, enc_dims[i - 1], enc_dims[i]))
    for i in range(1, len(dec_dims)):
        key, sub = jax.random.split(key)
        dec_params.append(_init_linear(sub, dec_dims[i - 1], dec_dims[i]))
    return enc_params, dec_params


def reference_forward(x, enc_params, dec_params, sigmoid=False):
    """Pure-JAX reference of AutoencoderModule.forward (noise=0, vae=False)."""
    h = x
    for i, (w, b) in enumerate(enc_params):
        h = h @ w + b
        if i < len(enc_params) - 1:
            h = jnp.maximum(h, 0.0)
    z = h
    h = z
    for i, (w, b) in enumerate(dec_params):
        h = h @ w + b
        if i < len(dec_params) - 1:
            h = jnp.maximum(h, 0.0)
    if sigmoid:
        h = jax.nn.sigmoid(h)
    return h, z


if __name__ == "__main__":
    input_dim = 16
    hidden_dims = (32, 16)
    z_dim = 8
    batch = 50          # non-multiple of the tile -> exercises batch padding

    key = jax.random.PRNGKey(0)
    key, kx, kp = jax.random.split(key, 3)
    x = jax.random.normal(kx, (batch, input_dim), jnp.float32)
    enc_params, dec_params = build_params(kp, input_dim, hidden_dims, z_dim)

    ref_out, ref_z = reference_forward(x, enc_params, dec_params, sigmoid=False)

    # f32 weights: strict check (default batch_tile -> TB auto-split to 32,
    # grid of 2 parallel steps).
    out, z = autoencoder_forward(x, enc_params, dec_params,
                                 sigmoid=False, weight_dtype=jnp.float32)
    out = jax.block_until_ready(out)
    z = jax.block_until_ready(z)
    assert out.shape == (batch, input_dim) and z.shape == (batch, z_dim)
    assert jnp.allclose(out, ref_out, atol=1e-5, rtol=1e-5)
    assert jnp.allclose(z, ref_z, atol=1e-5, rtol=1e-5)

    # bf16 weights: halved weight DMA / VMEM, native bf16 x bf16 MXU operands
    # with f32 accumulation (loose tolerance); small tile -> 4-step grid.
    out_bf, z_bf = autoencoder_forward(x, enc_params, dec_params,
                                       sigmoid=False,
                                       weight_dtype=jnp.bfloat16,
                                       batch_tile=16)
    out_bf = jax.block_until_ready(out_bf)
    z_bf = jax.block_until_ready(z_bf)
    assert jnp.allclose(out_bf, ref_out, atol=5e-2, rtol=5e-2)
    assert jnp.allclose(z_bf, ref_z, atol=5e-2, rtol=5e-2)

    # sigmoid decoder head path.
    ref_out_s, _ = reference_forward(x, enc_params, dec_params, sigmoid=True)
    out_s, _ = autoencoder_forward(x, enc_params, dec_params,
                                   sigmoid=True, weight_dtype=jnp.float32)
    out_s = jax.block_until_ready(out_s)
    assert jnp.allclose(out_s, ref_out_s, atol=1e-5, rtol=1e-5)

    print("KERNEL_OK")
</pallas_src>

<mosaic_0001>
module attributes {stable_mosaic.version = 11 : i64} {
  func.func @_ae_kernel(%arg0: i32, %arg1: memref<32x128xf32, #tpu.memory_space<vmem>>, %arg2: memref<128x128xf32, #tpu.memory_space<vmem>>, %arg3: memref<1x128xf32, #tpu.memory_space<vmem>>, %arg4: memref<128x128xf32, #tpu.memory_space<vmem>>, %arg5: memref<1x128xf32, #tpu.memory_space<vmem>>, %arg6: memref<128x128xf32, #tpu.memory_space<vmem>>, %arg7: memref<1x128xf32, #tpu.memory_space<vmem>>, %arg8: memref<128x128xf32, #tpu.memory_space<vmem>>, %arg9: memref<1x128xf32, #tpu.memory_space<vmem>>, %arg10: memref<128x128xf32, #tpu.memory_space<vmem>>, %arg11: memref<1x128xf32, #tpu.memory_space<vmem>>, %arg12: memref<128x128xf32, #tpu.memory_space<vmem>>, %arg13: memref<1x128xf32, #tpu.memory_space<vmem>>, %arg14: memref<32x128xf32, #tpu.memory_space<vmem>>, %arg15: memref<32x128xf32, #tpu.memory_space<vmem>>) attributes {dimension_semantics = [#tpu.dimension_semantics<parallel>], iteration_bounds = array<i64: 2>, scalar_prefetch = 0 : i64, scratch_operands = 0 : i64, tpu.core_type = #tpu.core_type<tc>, window_params = [{transform_indices = @transform_0, window_bounds = array<i64: 32, 128>}, {pipeline_mode = #tpu.pipeline_mode<synchronous>, transform_indices = @transform_1, window_bounds = array<i64: 128, 128>}, {pipeline_mode = #tpu.pipeline_mode<synchronous>, transform_indices = @transform_2, window_bounds = array<i64: 1, 128>}, {pipeline_mode = #tpu.pipeline_mode<synchronous>, transform_indices = @transform_3, window_bounds = array<i64: 128, 128>}, {pipeline_mode = #tpu.pipeline_mode<synchronous>, transform_indices = @transform_4, window_bounds = array<i64: 1, 128>}, {pipeline_mode = #tpu.pipeline_mode<synchronous>, transform_indices = @transform_5, window_bounds = array<i64: 128, 128>}, {pipeline_mode = #tpu.pipeline_mode<synchronous>, transform_indices = @transform_6, window_bounds = array<i64: 1, 128>}, {pipeline_mode = #tpu.pipeline_mode<synchronous>, transform_indices = @transform_7, window_bounds = array<i64: 128, 128>}, {pipeline_mode = #tpu.pipeline_mode<synchronous>, transform_indices = @transform_8, window_bounds = array<i64: 1, 128>}, {pipeline_mode = #tpu.pipeline_mode<synchronous>, transform_indices = @transform_9, window_bounds = array<i64: 128, 128>}, {pipeline_mode = #tpu.pipeline_mode<synchronous>, transform_indices = @transform_10, window_bounds = array<i64: 1, 128>}, {pipeline_mode = #tpu.pipeline_mode<synchronous>, transform_indices = @transform_11, window_bounds = array<i64: 128, 128>}, {pipeline_mode = #tpu.pipeline_mode<synchronous>, transform_indices = @transform_12, window_bounds = array<i64: 1, 128>}, {transform_indices = @transform_13, window_bounds = array<i64: 32, 128>}, {transform_indices = @transform_14, window_bounds = array<i64: 32, 128>}]} {
    %c0 = arith.constant 0 : index
    %c0_0 = arith.constant 0 : index
    %0 = vector.load %arg1[%c0, %c0_0] : memref<32x128xf32, #tpu.memory_space<vmem>>, vector<32x128xf32>
    %c0_1 = arith.constant 0 : index
    %c0_2 = arith.constant 0 : index
    %1 = vector.load %arg2[%c0_1, %c0_2] : memref<128x128xf32, #tpu.memory_space<vmem>>, vector<128x128xf32>
    %c0_3 = arith.constant 0 : index
    %c0_4 = arith.constant 0 : index
    %2 = vector.load %arg3[%c0_3, %c0_4] : memref<1x128xf32, #tpu.memory_space<vmem>>, vector<1x128xf32>
    %cst = arith.constant dense<0.000000e+00> : vector<32x128xf32>
    %3 = tpu.matmul %0, %1, %cst {dimension_numbers = #tpu.dot_dimension_numbers<[1], [0], [0], [1], [0, 0, 1, 1], [], []>} : vector<32x128xf32>, vector<128x128xf32>, vector<32x128xf32> -> vector<32x128xf32>
    %4 = vector.broadcast %2 : vector<1x128xf32> to vector<32x128xf32>
    %5 = arith.addf %3, %4 : vector<32x128xf32>
    %cst_5 = arith.constant 0.000000e+00 : f32
    %6 = vector.broadcast %cst_5 : f32 to vector<32x128xf32>
    %7 = arith.maximumf %5, %6 : vector<32x128xf32>
    %c0_6 = arith.constant 0 : index
    %c0_7 = arith.constant 0 : index
    %8 = vector.load %arg4[%c0_6, %c0_7] : memref<128x128xf32, #tpu.memory_space<vmem>>, vector<128x128xf32>
    %c0_8 = arith.constant 0 : index
    %c0_9 = arith.constant 0 : index
    %9 = vector.load %arg5[%c0_8, %c0_9] : memref<1x128xf32, #tpu.memory_space<vmem>>, vector<1x128xf32>
    %cst_10 = arith.constant dense<0.000000e+00> : vector<32x128xf32>
    %10 = tpu.matmul %7, %8, %cst_10 {dimension_numbers = #tpu.dot_dimension_numbers<[1], [0], [0], [1], [0, 0, 1, 1], [], []>} : vector<32x128xf32>, vector<128x128xf32>, vector<32x128xf32> -> vector<32x128xf32>
    %11 = vector.broadcast %9 : vector<1x128xf32> to vector<32x128xf32>
    %12 = arith.addf %10, %11 : vector<32x128xf32>
    %cst_11 = arith.constant 0.000000e+00 : f32
    %13 = vector.broadcast %cst_11 : f32 to vector<32x128xf32>
    %14 = arith.maximumf %12, %13 : vector<32x128xf32>
    %c0_12 = arith.constant 0 : index
    %c0_13 = arith.constant 0 : index
    %15 = vector.load %arg6[%c0_12, %c0_13] : memref<128x128xf32, #tpu.memory_space<vmem>>, vector<128x128xf32>
    %c0_14 = arith.constant 0 : index
    %c0_15 = arith.constant 0 : index
    %16 = vector.load %arg7[%c0_14, %c0_15] : memref<1x128xf32, #tpu.memory_space<vmem>>, vector<1x128xf32>
    %cst_16 = arith.constant dense<0.000000e+00> : vector<32x128xf32>
    %17 = tpu.matmul %14, %15, %cst_16 {dimension_numbers = #tpu.dot_dimension_numbers<[1], [0], [0], [1], [0, 0, 1, 1], [], []>} : vector<32x128xf32>, vector<128x128xf32>, vector<32x128xf32> -> vector<32x128xf32>
    %18 = vector.broadcast %16 : vector<1x128xf32> to vector<32x128xf32>
    %19 = arith.addf %17, %18 : vector<32x128xf32>
    %c0_17 = arith.constant 0 : index
    %c0_18 = arith.constant 0 : index
    %20 = vector.load %arg15[%c0_17, %c0_18] : memref<32x128xf32, #tpu.memory_space<vmem>>, vector<32x128xf32>
    tpu.vector_store %arg15[%c0_17, %c0_18], %19 {strides = array<i32>} : memref<32x128xf32, #tpu.memory_space<vmem>>, vector<32x128xf32>,
    %c0_19 = arith.constant 0 : index
    %c0_20 = arith.constant 0 : index
    %21 = vector.load %arg8[%c0_19, %c0_20] : memref<128x128xf32, #tpu.memory_space<vmem>>, vector<128x128xf32>
    %c0_21 = arith.constant 0 : index
    %c0_22 = arith.constant 0 : index
    %22 = vector.load %arg9[%c0_21, %c0_22] : memref<1x128xf32, #tpu.memory_space<vmem>>, vector<1x128xf32>
    %cst_23 = arith.constant dense<0.000000e+00> : vector<32x128xf32>
    %23 = tpu.matmul %19, %21, %cst_23 {dimension_numbers = #tpu.dot_dimension_numbers<[1], [0], [0], [1], [0, 0, 1, 1], [], []>} : vector<32x128xf32>, vector<128x128xf32>, vector<32x128xf32> -> vector<32x128xf32>
    %24 = vector.broadcast %22 : vector<1x128xf32> to vector<32x128xf32>
    %25 = arith.addf %23, %24 : vector<32x128xf32>
    %cst_24 = arith.constant 0.000000e+00 : f32
    %26 = vector.broadcast %cst_24 : f32 to vector<32x128xf32>
    %27 = arith.maximumf %25, %26 : vector<32x128xf32>
    %c0_25 = arith.constant 0 : index
    %c0_26 = arith.constant 0 : index
    %28 = vector.load %arg10[%c0_25, %c0_26] : memref<128x128xf32, #tpu.memory_space<vmem>>, vector<128x128xf32>
    %c0_27 = arith.constant 0 : index
    %c0_28 = arith.constant 0 : index
    %29 = vector.load %arg11[%c0_27, %c0_28] : memref<1x128xf32, #tpu.memory_space<vmem>>, vector<1x128xf32>
    %cst_29 = arith.constant dense<0.000000e+00> : vector<32x128xf32>
    %30 = tpu.matmul %27, %28, %cst_29 {dimension_numbers = #tpu.dot_dimension_numbers<[1], [0], [0], [1], [0, 0, 1, 1], [], []>} : vector<32x128xf32>, vector<128x128xf32>, vector<32x128xf32> -> vector<32x128xf32>
    %31 = vector.broadcast %29 : vector<1x128xf32> to vector<32x128xf32>
    %32 = arith.addf %30, %31 : vector<32x128xf32>
    %cst_30 = arith.constant 0.000000e+00 : f32
    %33 = vector.broadcast %cst_30 : f32 to vector<32x128xf32>
    %34 = arith.maximumf %32, %33 : vector<32x128xf32>
    %c0_31 = arith.constant 0 : index
    %c0_32 = arith.constant 0 : index
    %35 = vector.load %arg12[%c0_31, %c0_32] : memref<128x128xf32, #tpu.memory_space<vmem>>, vector<128x128xf32>
    %c0_33 = arith.constant 0 : index
    %c0_34 = arith.constant 0 : index
    %36 = vector.load %arg13[%c0_33, %c0_34] : memref<1x128xf32, #tpu.memory_space<vmem>>, vector<1x128xf32>
    %cst_35 = arith.constant dense<0.000000e+00> : vector<32x128xf32>
    %37 = tpu.matmul %34, %35, %cst_35 {dimension_numbers = #tpu.dot_dimension_numbers<[1], [0], [0], [1], [0, 0, 1, 1], [], []>} : vector<32x128xf32>, vector<128x128xf32>, vector<32x128xf32> -> vector<32x128xf32>
    %38 = vector.broadcast %36 : vector<1x128xf32> to vector<32x128xf32>
    %39 = arith.addf %37, %38 : vector<32x128xf32>
    %c0_36 = arith.constant 0 : index
    %c0_37 = arith.constant 0 : index
    %40 = vector.load %arg14[%c0_36, %c0_37] : memref<32x128xf32, #tpu.memory_space<vmem>>, vector<32x128xf32>
    tpu.vector_store %arg14[%c0_36, %c0_37], %39 {strides = array<i32>} : memref<32x128xf32, #tpu.memory_space<vmem>>, vector<32x128xf32>,
    return
  }
  func.func @transform_0(%arg0: i32) -> (i32, i32) {
    %c0_i32 = arith.constant 0 : i32
    %c0_i32_0 = arith.constant 0 : i32
    return %arg0, %c0_i32 : i32, i32
  }
  func.func @transform_1(%arg0: i32) -> (i32, i32) {
    %c0_i32 = arith.constant 0 : i32
    %c0_i32_0 = arith.constant 0 : i32
    %c0_i32_1 = arith.constant 0 : i32
    return %c0_i32, %c0_i32_0 : i32, i32
  }
  func.func @transform_2(%arg0: i32) -> (i32, i32) {
    %c0_i32 = arith.constant 0 : i32
    %c0_i32_0 = arith.constant 0 : i32
    %c0_i32_1 = arith.constant 0 : i32
    return %c0_i32, %c0_i32_0 : i32, i32
  }
  func.func @transform_3(%arg0: i32) -> (i32, i32) {
    %c0_i32 = arith.constant 0 : i32
    %c0_i32_0 = arith.constant 0 : i32
    %c0_i32_1 = arith.constant 0 : i32
    return %c0_i32, %c0_i32_0 : i32, i32
  }
  func.func @transform_4(%arg0: i32) -> (i32, i32) {
    %c0_i32 = arith.constant 0 : i32
    %c0_i32_0 = arith.constant 0 : i32
    %c0_i32_1 = arith.constant 0 : i32
    return %c0_i32, %c0_i32_0 : i32, i32
  }
  func.func @transform_5(%arg0: i32) -> (i32, i32) {
    %c0_i32 = arith.constant 0 : i32
    %c0_i32_0 = arith.constant 0 : i32
    %c0_i32_1 = arith.constant 0 : i32
    return %c0_i32, %c0_i32_0 : i32, i32
  }
  func.func @transform_6(%arg0: i32) -> (i32, i32) {
    %c0_i32 = arith.constant 0 : i32
    %c0_i32_0 = arith.constant 0 : i32
    %c0_i32_1 = arith.constant 0 : i32
    return %c0_i32, %c0_i32_0 : i32, i32
  }
  func.func @transform_7(%arg0: i32) -> (i32, i32) {
    %c0_i32 = arith.constant 0 : i32
    %c0_i32_0 = arith.constant 0 : i32
    %c0_i32_1 = arith.constant 0 : i32
    return %c0_i32, %c0_i32_0 : i32, i32
  }
  func.func @transform_8(%arg0: i32) -> (i32, i32) {
    %c0_i32 = arith.constant 0 : i32
    %c0_i32_0 = arith.constant 0 : i32
    %c0_i32_1 = arith.constant 0 : i32
    return %c0_i32, %c0_i32_0 : i32, i32
  }
  func.func @transform_9(%arg0: i32) -> (i32, i32) {
    %c0_i32 = arith.constant 0 : i32
    %c0_i32_0 = arith.constant 0 : i32
    %c0_i32_1 = arith.constant 0 : i32
    return %c0_i32, %c0_i32_0 : i32, i32
  }
  func.func @transform_10(%arg0: i32) -> (i32, i32) {
    %c0_i32 = arith.constant 0 : i32
    %c0_i32_0 = arith.constant 0 : i32
    %c0_i32_1 = arith.constant 0 : i32
    return %c0_i32, %c0_i32_0 : i32, i32
  }
  func.func @transform_11(%arg0: i32) -> (i32, i32) {
    %c0_i32 = arith.constant 0 : i32
    %c0_i32_0 = arith.constant 0 : i32
    %c0_i32_1 = arith.constant 0 : i32
    return %c0_i32, %c0_i32_0 : i32, i32
  }
  func.func @transform_12(%arg0: i32) -> (i32, i32) {
    %c0_i32 = arith.constant 0 : i32
    %c0_i32_0 = arith.constant 0 : i32
    %c0_i32_1 = arith.constant 0 : i32
    return %c0_i32, %c0_i32_0 : i32, i32
  }
  func.func @transform_13(%arg0: i32) -> (i32, i32) {
    %c0_i32 = arith.constant 0 : i32
    %c0_i32_0 = arith.constant 0 : i32
    return %arg0, %c0_i32 : i32, i32
  }
  func.func @transform_14(%arg0: i32) -> (i32, i32) {
    %c0_i32 = arith.constant 0 : i32
    %c0_i32_0 = arith.constant 0 : i32
    return %arg0, %c0_i32 : i32, i32
  }
}

module attributes {stable_mosaic.version = 11 : i64} {
  func.func @_ae_kernel(%arg0: i32, %arg1: memref<32x128xf32, #tpu.memory_space<vmem>>, %arg2: memref<128x128xf32, #tpu.memory_space<vmem>>, %arg3: memref<1x128xf32, #tpu.memory_space<vmem>>, %arg4: memref<128x128xf32, #tpu.memory_space<vmem>>, %arg5: memref<1x128xf32, #tpu.memory_space<vmem>>, %arg6: memref<128x128xf32, #tpu.memory_space<vmem>>, %arg7: memref<1x128xf32, #tpu.memory_space<vmem>>, %arg8: memref<128x128xf32, #tpu.memory_space<vmem>>, %arg9: memref<1x128xf32, #tpu.memory_space<vmem>>, %arg10: memref<128x128xf32, #tpu.memory_space<vmem>>, %arg11: memref<1x128xf32, #tpu.memory_space<vmem>>, %arg12: memref<128x128xf32, #tpu.memory_space<vmem>>, %arg13: memref<1x128xf32, #tpu.memory_space<vmem>>, %arg14: memref<32x128xf32, #tpu.memory_space<vmem>>, %arg15: memref<32x128xf32, #tpu.memory_space<vmem>>) attributes {dimension_semantics = [#tpu.dimension_semantics<parallel>], iteration_bounds = array<i64: 2>, scalar_prefetch = 0 : i64, scratch_operands = 0 : i64, tpu.core_type = #tpu.core_type<tc>, window_params = [{transform_indices = @transform_0, window_bounds = array<i64: 32, 128>}, {pipeline_mode = #tpu.pipeline_mode<synchronous>, transform_indices = @transform_1, window_bounds = array<i64: 128, 128>}, {pipeline_mode = #tpu.pipeline_mode<synchronous>, transform_indices = @transform_2, window_bounds = array<i64: 1, 128>}, {pipeline_mode = #tpu.pipeline_mode<synchronous>, transform_indices = @transform_3, window_bounds = array<i64: 128, 128>}, {pipeline_mode = #tpu.pipeline_mode<synchronous>, transform_indices = @transform_4, window_bounds = array<i64: 1, 128>}, {pipeline_mode = #tpu.pipeline_mode<synchronous>, transform_indices = @transform_5, window_bounds = array<i64: 128, 128>}, {pipeline_mode = #tpu.pipeline_mode<synchronous>, transform_indices = @transform_6, window_bounds = array<i64: 1, 128>}, {pipeline_mode = #tpu.pipeline_mode<synchronous>, transform_indices = @transform_7, window_bounds = array<i64: 128, 128>}, {pipeline_mode = #tpu.pipeline_mode<synchronous>, transform_indices = @transform_8, window_bounds = array<i64: 1, 128>}, {pipeline_mode = #tpu.pipeline_mode<synchronous>, transform_indices = @transform_9, window_bounds = array<i64: 128, 128>}, {pipeline_mode = #tpu.pipeline_mode<synchronous>, transform_indices = @transform_10, window_bounds = array<i64: 1, 128>}, {pipeline_mode = #tpu.pipeline_mode<synchronous>, transform_indices = @transform_11, window_bounds = array<i64: 128, 128>}, {pipeline_mode = #tpu.pipeline_mode<synchronous>, transform_indices = @transform_12, window_bounds = array<i64: 1, 128>}, {transform_indices = @transform_13, window_bounds = array<i64: 32, 128>}, {transform_indices = @transform_14, window_bounds = array<i64: 32, 128>}]} {
    %c0 = arith.constant 0 : index
    %c0_0 = arith.constant 0 : index
    %0 = vector.load %arg1[%c0, %c0_0] : memref<32x128xf32, #tpu.memory_space<vmem>>, vector<32x128xf32>
    %c0_1 = arith.constant 0 : index
    %c0_2 = arith.constant 0 : index
    %1 = vector.load %arg2[%c0_1, %c0_2] : memref<128x128xf32, #tpu.memory_space<vmem>>, vector<128x128xf32>
    %c0_3 = arith.constant 0 : index
    %c0_4 = arith.constant 0 : index
    %2 = vector.load %arg3[%c0_3, %c0_4] : memref<1x128xf32, #tpu.memory_space<vmem>>, vector<1x128xf32>
    %cst = arith.constant dense<0.000000e+00> : vector<32x128xf32>
    %3 = tpu.matmul %0, %1, %cst {dimension_numbers = #tpu.dot_dimension_numbers<[1], [0], [0], [1], [0, 0, 1, 1], [], []>} : vector<32x128xf32>, vector<128x128xf32>, vector<32x128xf32> -> vector<32x128xf32>
    %4 = vector.broadcast %2 : vector<1x128xf32> to vector<32x128xf32>
    %5 = arith.addf %3, %4 : vector<32x128xf32>
    %cst_5 = arith.constant 0.000000e+00 : f32
    %6 = vector.broadcast %cst_5 : f32 to vector<32x128xf32>
    %7 = arith.maximumf %5, %6 : vector<32x128xf32>
    %c0_6 = arith.constant 0 : index
    %c0_7 = arith.constant 0 : index
    %8 = vector.load %arg4[%c0_6, %c0_7] : memref<128x128xf32, #tpu.memory_space<vmem>>, vector<128x128xf32>
    %c0_8 = arith.constant 0 : index
    %c0_9 = arith.constant 0 : index
    %9 = vector.load %arg5[%c0_8, %c0_9] : memref<1x128xf32, #tpu.memory_space<vmem>>, vector<1x128xf32>
    %cst_10 = arith.constant dense<0.000000e+00> : vector<32x128xf32>
    %10 = tpu.matmul %7, %8, %cst_10 {dimension_numbers = #tpu.dot_dimension_numbers<[1], [0], [0], [1], [0, 0, 1, 1], [], []>} : vector<32x128xf32>, vector<128x128xf32>, vector<32x128xf32> -> vector<32x128xf32>
    %11 = vector.broadcast %9 : vector<1x128xf32> to vector<32x128xf32>
    %12 = arith.addf %10, %11 : vector<32x128xf32>
    %cst_11 = arith.constant 0.000000e+00 : f32
    %13 = vector.broadcast %cst_11 : f32 to vector<32x128xf32>
    %14 = arith.maximumf %12, %13 : vector<32x128xf32>
    %c0_12 = arith.constant 0 : index
    %c0_13 = arith.constant 0 : index
    %15 = vector.load %arg6[%c0_12, %c0_13] : memref<128x128xf32, #tpu.memory_space<vmem>>, vector<128x128xf32>
    %c0_14 = arith.constant 0 : index
    %c0_15 = arith.constant 0 : index
    %16 = vector.load %arg7[%c0_14, %c0_15] : memref<1x128xf32, #tpu.memory_space<vmem>>, vector<1x128xf32>
    %cst_16 = arith.constant dense<0.000000e+00> : vector<32x128xf32>
    %17 = tpu.matmul %14, %15, %cst_16 {dimension_numbers = #tpu.dot_dimension_numbers<[1], [0], [0], [1], [0, 0, 1, 1], [], []>} : vector<32x128xf32>, vector<128x128xf32>, vector<32x128xf32> -> vector<32x128xf32>
    %18 = vector.broadcast %16 : vector<1x128xf32> to vector<32x128xf32>
    %19 = arith.addf %17, %18 : vector<32x128xf32>
    %c0_17 = arith.constant 0 : index
    %c0_18 = arith.constant 0 : index
    %20 = vector.load %arg15[%c0_17, %c0_18] : memref<32x128xf32, #tpu.memory_space<vmem>>, vector<32x128xf32>
    tpu.vector_store %arg15[%c0_17, %c0_18], %19 {strides = array<i32>} : memref<32x128xf32, #tpu.memory_space<vmem>>, vector<32x128xf32>,
    %c0_19 = arith.constant 0 : index
    %c0_20 = arith.constant 0 : index
    %21 = vector.load %arg8[%c0_19, %c0_20] : memref<128x128xf32, #tpu.memory_space<vmem>>, vector<128x128xf32>
    %c0_21 = arith.constant 0 : index
    %c0_22 = arith.constant 0 : index
    %22 = vector.load %arg9[%c0_21, %c0_22] : memref<1x128xf32, #tpu.memory_space<vmem>>, vector<1x128xf32>
    %cst_23 = arith.constant dense<0.000000e+00> : vector<32x128xf32>
    %23 = tpu.matmul %19, %21, %cst_23 {dimension_numbers = #tpu.dot_dimension_numbers<[1], [0], [0], [1], [0, 0, 1, 1], [], []>} : vector<32x128xf32>, vector<128x128xf32>, vector<32x128xf32> -> vector<32x128xf32>
    %24 = vector.broadcast %22 : vector<1x128xf32> to vector<32x128xf32>
    %25 = arith.addf %23, %24 : vector<32x128xf32>
    %cst_24 = arith.constant 0.000000e+00 : f32
    %26 = vector.broadcast %cst_24 : f32 to vector<32x128xf32>
    %27 = arith.maximumf %25, %26 : vector<32x128xf32>
    %c0_25 = arith.constant 0 : index
    %c0_26 = arith.constant 0 : index
    %28 = vector.load %arg10[%c0_25, %c0_26] : memref<128x128xf32, #tpu.memory_space<vmem>>, vector<128x128xf32>
    %c0_27 = arith.constant 0 : index
    %c0_28 = arith.constant 0 : index
    %29 = vector.load %arg11[%c0_27, %c0_28] : memref<1x128xf32, #tpu.memory_space<vmem>>, vector<1x128xf32>
    %cst_29 = arith.constant dense<0.000000e+00> : vector<32x128xf32>
    %30 = tpu.matmul %27, %28, %cst_29 {dimension_numbers = #tpu.dot_dimension_numbers<[1], [0], [0], [1], [0, 0, 1, 1], [], []>} : vector<32x128xf32>, vector<128x128xf32>, vector<32x128xf32> -> vector<32x128xf32>
    %31 = vector.broadcast %29 : vector<1x128xf32> to vector<32x128xf32>
    %32 = arith.addf %30, %31 : vector<32x128xf32>
    %cst_30 = arith.constant 0.000000e+00 : f32
    %33 = vector.broadcast %cst_30 : f32 to vector<32x128xf32>
    %34 = arith.maximumf %32, %33 : vector<32x128xf32>
    %c0_31 = arith.constant 0 : index
    %c0_32 = arith.constant 0 : index
    %35 = vector.load %arg12[%c0_31, %c0_32] : memref<128x128xf32, #tpu.memory_space<vmem>>, vector<128x128xf32>
    %c0_33 = arith.constant 0 : index
    %c0_34 = arith.constant 0 : index
    %36 = vector.load %arg13[%c0_33, %c0_34] : memref<1x128xf32, #tpu.memory_space<vmem>>, vector<1x128xf32>
    %cst_35 = arith.constant dense<0.000000e+00> : vector<32x128xf32>
    %37 = tpu.matmul %34, %35, %cst_35 {dimension_numbers = #tpu.dot_dimension_numbers<[1], [0], [0], [1], [0, 0, 1, 1], [], []>} : vector<32x128xf32>, vector<128x128xf32>, vector<32x128xf32> -> vector<32x128xf32>
    %38 = vector.broadcast %36 : vector<1x128xf32> to vector<32x128xf32>
    %39 = arith.addf %37, %38 : vector<32x128xf32>
    %c0_36 = arith.constant 0 : index
    %c0_37 = arith.constant 0 : index
    %40 = vector.load %arg14[%c0_36, %c0_37] : memref<32x128xf32, #tpu.memory_space<vmem>>, vector<32x128xf32>
    tpu.vector_store %arg14[%c0_36, %c0_37], %39 {strides = array<i32>} : memref<32x128xf32, #tpu.memory_space<vmem>>, vector<32x128xf32>,
    return
  }
  func.func @transform_0(%arg0: i32) -> (i32, i32) {
    %c0_i32 = arith.constant 0 : i32
    %c0_i32_0 = arith.constant 0 : i32
    return %arg0, %c0_i32 : i32, i32
  }
  func.func @transform_1(%arg0: i32) -> (i32, i32) {
    %c0_i32 = arith.constant 0 : i32
    %c0_i32_0 = arith.constant 0 : i32
    %c0_i32_1 = arith.constant 0 : i32
    return %c0_i32, %c0_i32_0 : i32, i32
  }
  func.func @transform_2(%arg0: i32) -> (i32, i32) {
    %c0_i32 = arith.constant 0 : i32
    %c0_i32_0 = arith.constant 0 : i32
    %c0_i32_1 = arith.constant 0 : i32
    return %c0_i32, %c0_i32_0 : i32, i32
  }
  func.func @transform_3(%arg0: i32) -> (i32, i32) {
    %c0_i32 = arith.constant 0 : i32
    %c0_i32_0 = arith.constant 0 : i32
    %c0_i32_1 = arith.constant 0 : i32
    return %c0_i32, %c0_i32_0 : i32, i32
  }
  func.func @transform_4(%arg0: i32) -> (i32, i32) {
    %c0_i32 = arith.constant 0 : i32
    %c0_i32_0 = arith.constant 0 : i32
    %c0_i32_1 = arith.constant 0 : i32
    return %c0_i32, %c0_i32_0 : i32, i32
  }
  func.func @transform_5(%arg0: i32) -> (i32, i32) {
    %c0_i32 = arith.constant 0 : i32
    %c0_i32_0 = arith.constant 0 : i32
    %c0_i32_1 = arith.constant 0 : i32
    return %c0_i32, %c0_i32_0 : i32, i32
  }
  func.func @transform_6(%arg0: i32) -> (i32, i32) {
    %c0_i32 = arith.constant 0 : i32
    %c0_i32_0 = arith.constant 0 : i32
    %c0_i32_1 = arith.constant 0 : i32
    return %c0_i32, %c0_i32_0 : i32, i32
  }
  func.func @transform_7(%arg0: i32) -> (i32, i32) {
    %c0_i32 = arith.constant 0 : i32
    %c0_i32_0 = arith.constant 0 : i32
    %c0_i32_1 = arith.constant 0 : i32
    return %c0_i32, %c0_i32_0 : i32, i32
  }
  func.func @transform_8(%arg0: i32) -> (i32, i32) {
    %c0_i32 = arith.constant 0 : i32
    %c0_i32_0 = arith.constant 0 : i32
    %c0_i32_1 = arith.constant 0 : i32
    return %c0_i32, %c0_i32_0 : i32, i32
  }
  func.func @transform_9(%arg0: i32) -> (i32, i32) {
    %c0_i32 = arith.constant 0 : i32
    %c0_i32_0 = arith.constant 0 : i32
    %c0_i32_1 = arith.constant 0 : i32
    return %c0_i32, %c0_i32_0 : i32, i32
  }
  func.func @transform_10(%arg0: i32) -> (i32, i32) {
    %c0_i32 = arith.constant 0 : i32
    %c0_i32_0 = arith.constant 0 : i32
    %c0_i32_1 = arith.constant 0 : i32
    return %c0_i32, %c0_i32_0 : i32, i32
  }
  func.func @transform_11(%arg0: i32) -> (i32, i32) {
    %c0_i32 = arith.constant 0 : i32
    %c0_i32_0 = arith.constant 0 : i32
    %c0_i32_1 = arith.constant 0 : i32
    return %c0_i32, %c0_i32_0 : i32, i32
  }
  func.func @transform_12(%arg0: i32) -> (i32, i32) {
    %c0_i32 = arith.constant 0 : i32
    %c0_i32_0 = arith.constant 0 : i32
    %c0_i32_1 = arith.constant 0 : i32
    return %c0_i32, %c0_i32_0 : i32, i32
  }
  func.func @transform_13(%arg0: i32) -> (i32, i32) {
    %c0_i32 = arith.constant 0 : i32
    %c0_i32_0 = arith.constant 0 : i32
    return %arg0, %c0_i32 : i32, i32
  }
  func.func @transform_14(%arg0: i32) -> (i32, i32) {
    %c0_i32 = arith.constant 0 : i32
    %c0_i32_0 = arith.constant 0 : i32
    return %arg0, %c0_i32 : i32, i32
  }
}

</mosaic_0001>

<bundles_post_ra>
// kernel: tpu_custom_call.1
= control target key start
LH: loop header
LB: loop body
LE: loop exit
PB: predicated region body
PF: predicated region fallthrough
CT: control target
= control target key end

     0   :  { %s1980_s0 = inlined_call_operand.hbm [shape: f32[64,128], index: 0, kind: input, shape index: {}]   ;;  %s1981_s1 = inlined_call_operand.hbm [shape: f32[128,128], index: 1, kind: input, shape index: {}]   ;;  %s1982_s2 = inlined_call_operand.vmem [shape: f32[1,128], index: 2, kind: input, shape index: {}]   ;;  %s1983_s3 = inlined_call_operand.hbm [shape: f32[128,128], index: 3, kind: input, shape index: {}]   ;;  %s1984_s4 = inlined_call_operand.vmem [shape: f32[1,128], index: 4, kind: input, shape index: {}]   ;;  %s1985_s5 = inlined_call_operand.hbm [shape: f32[128,128], index: 5, kind: input, shape index: {}]   ;;  %s1986_s6 = inlined_call_operand.vmem [shape: f32[1,128], index: 6, kind: input, shape index: {}]   ;;  %s1987_s7 = inlined_call_operand.hbm [shape: f32[128,128], index: 7, kind: input, shape index: {}]   ;;  %s1988_s8 = inlined_call_operand.vmem [shape: f32[1,128], index: 8, kind: input, shape index: {}]   ;;  %s1989_s9 = inlined_call_operand.hbm [shape: f32[128,128], index: 9, kind: input, shape index: {}]   ;;  %s1990_s10 = inlined_call_operand.vmem [shape: f32[1,128], index: 10, kind: input, shape index: {}]   ;;  %s1991_s11 = inlined_call_operand.hbm [shape: f32[128,128], index: 11, kind: input, shape index: {}]   ;;  %s1992_s12 = inlined_call_operand.vmem [shape: f32[1,128], index: 12, kind: input, shape index: {}]   ;;  %s1993_s13 = inlined_call_operand.hbm [shape: f32[64,128], index: 13, kind: output, shape index: {0}]   ;;  %s1994_s14 = inlined_call_operand.hbm [shape: f32[64,128], index: 14, kind: output, shape index: {1}]  }
   0x1   :  { %1998 = sst [smem:[#allocation24_spill]] %s1981_s1 }
   0x2   :  { %1999 = sst [smem:[#allocation25_spill]] %s1983_s3 }
   0x3   :  { %2000 = sst [smem:[#allocation26_spill]] %s1985_s5 }
   0x4   :  { %2001 = sst [smem:[#allocation27_spill]] %s1987_s7 }
   0x5   :  { %2002 = sst [smem:[#allocation28_spill]] %s1989_s9 }
   0x6   :  { %2003 = sst [smem:[#allocation29_spill]] %s1991_s11 }
   0x7   :  { %2004 = sst [smem:[#allocation30_spill]] %s1992_s12 }
   0x8   :  { %2005 = sst [smem:[#allocation31_spill]] %s1993_s13 }
   0x9   :  { %20 = vsyncpa [#allocation3], 0 }
   0xa   :  { %22 = vsyncpa [#allocation3 + $0x1], 0 }
   0xb   :  { %23 = vsyncpa [#allocation6], 0 }
   0xc   :  { %24 = vsyncpa [#allocation9], 0 }
   0xd   :  { %25 = vsyncpa [#allocation12], 0 }
   0xe   :  { %26 = vsyncpa [#allocation4], 0 }
   0xf   :  { %28 = vsyncpa [#allocation4 + $0x1], 0 }
  0x10   :  { %29 = vsyncpa [#allocation16], 0 }
  0x11   :  { %31 = vsyncpa [#allocation16 + $0x1], 0  ;;  %s1718_s29 = smov 0   ;;  %s1720_s30 = smov 0  }
  0x12   :  { %s1722_s15 = smov 0   ;;  %s1724_s16 = smov 0  }
  0x13 LB: > { %s2006_s1 = sld [smem:[#allocation24_spill]]  ;;  %s1742_s20 = sadd.s32 4294967295, %s1631_s16   ;;  %s1631_s16 = sphi %s1724_s16, %s2029_s16   ;;  %s1627_s15 = sphi %s1722_s15, %s2028_s15   ;;  %s1623_s30 = sphi %s1720_s30, %s2027_s30   ;;  %s1619_s29 = sphi %s1718_s29, %s2026_s29  }
  0x14   : > { %p1125_p0 = scmp.ge.s32.totalorder %s1631_s16, 1  ;;  %p58_p1 = scmp.eq.s32.totalorder %s1742_s20, 0 }
  0x15   : > { %p372_p2 = scmp.lt.s32.totalorder %s1631_s16, 3  ;;  %s1633_s22 = smov [#allocation5]  }
  0x16   : > { %s385_s23 = sshll.u32 %s1633_s22, 4  ;;  %s2008_s5 = sld [smem:[#allocation26_spill]]  ;;  %s386_s23 = int_to_ptr.vmem [resolvable:$true] %s385_s23 }
  0x17   : > { %p1747_p3 = pnand %p1125_p0, %p372_p2  ;;  %s2010_s9 = sld [smem:[#allocation28_spill]] }
  0x18   : > { %s1634_s22 = smov [#allocation8]   ;;  %s1996_s13 = smov 128  }
  0x19   : > { %s383_s19 = sshll.u32 %s2006_s1, 4  ;;  %p1219_p4 = pneg %p1747_p3  ;;  %s384_s19 = int_to_ptr.hbm [resolvable:$true] %s383_s19 }
  0x1a   : > { %s419_s1 = sshll.u32 %s1634_s22, 4  ;;  %s1997_s12 = smov 8   ;;  %s420_s1 = int_to_ptr.vmem [resolvable:$true] %s419_s1 }
  0x1b   : > { %p1759_p6 = pnand %p1219_p4, %p58_p1  ;;  %s2011_s3 = sld [smem:[#allocation25_spill]] }
  0x1c   : > { %s417_s26 = sshll.u32 %s2008_s5, 4  ;;  %s1637_s17 = smov [#allocation11]   ;;  %s418_s26 = int_to_ptr.hbm [resolvable:$true] %s417_s26 }
  0x1d   : > { %s451_s18 = sshll.u32 %s2010_s9, 4  ;;  %s453_s22 = sshll.u32 %s1637_s17, 4  ;;  %s452_s18 = int_to_ptr.hbm [resolvable:$true] %s451_s18  ;;  %s454_s22 = int_to_ptr.vmem [resolvable:$true] %s453_s22 }
  0x1e   : > { %1222 = dma.hbm_to_vmem [thread:$0]  (!%p1759_p6), %s384_s19, 2048, %s386_s23, [#allocation6], %s1996_s13, %s1996_s13, %s1997_s12  }
  0x1f   : > { %1228 = dma.hbm_to_vmem [thread:$0]  (!%p1759_p6), %s418_s26, 2048, %s420_s1, [#allocation9], %s1996_s13, %s1996_s13, %s1997_s12  }
  0x20   : > { %1234 = dma.hbm_to_vmem [thread:$0]  (!%p1759_p6), %s452_s18, 2048, %s454_s22, [#allocation12], %s1996_s13, %s1996_s13, %s1997_s12  }
  0x21   : > { %s400_s28 = sshll.u32 %s2011_s3, 4  ;;  %s1638_s19 = smov [#allocation7]   ;;  %s401_s28 = int_to_ptr.hbm [resolvable:$true] %s400_s28 }
  0x22   : > { %s402_s23 = sshll.u32 %s1638_s19, 4  ;;  %s2012_s7 = sld [smem:[#allocation27_spill]]  ;;  %s403_s23 = int_to_ptr.vmem [resolvable:$true] %s402_s23 }
  0x23   : > { %1225 = dma.hbm_to_vmem [thread:$0]  (!%p1759_p6), %s401_s28, 2048, %s403_s23, [#allocation6], %s1996_s13, %s1996_s13, %s1997_s12  }
  0x24   : > { %s2013_s11 = sld [smem:[#allocation29_spill]]  ;;  %s1639_s17 = smov [#allocation10]  }
  0x25   : > { %s436_s5 = sshll.u32 %s1639_s17, 4  ;;  %s1640_s28 = smov [#allocation13]   ;;  %s437_s5 = int_to_ptr.vmem [resolvable:$true] %s436_s5 }
  0x26   : > { %s470_s22 = sshll.u32 %s1640_s28, 4  ;;  %s1124_s19 = sadd.s32 4294967294, %s1631_s16   ;;  %s471_s22 = int_to_ptr.vmem [resolvable:$true] %s470_s22 }
  0x27   : > { %s1807_s23 = sadd.s32 1, %s1631_s16   ;;  %s44_s24 = sadd.s32 1, %s1627_s15 }
  0x28   : > { %s434_s26 = sshll.u32 %s2012_s7, 4  ;;  %s41_s1 = ssub.s32 %s1631_s16, %s1807_s23  ;;  %s435_s26 = int_to_ptr.hbm [resolvable:$true] %s434_s26 }
  0x29   : > { %1231 = dma.hbm_to_vmem [thread:$0]  (!%p1759_p6), %s435_s26, 2048, %s437_s5, [#allocation9], %s1996_s13, %s1996_s13, %s1997_s12  }
  0x2a   : > { %s468_s25 = sshll.u32 %s2013_s11, 4  ;;  %p42_p7 = scmp.eq.s32.totalorder %s41_s1, 0  ;;  %s469_s25 = int_to_ptr.hbm [resolvable:$true] %s468_s25 }
  0x2b   : > { %1237 = dma.hbm_to_vmem [thread:$0]  (!%p1759_p6), %s469_s25, 2048, %s471_s22, [#allocation12], %s1996_s13, %s1996_s13, %s1997_s12  }
  0x2c   : > { %p51_p8 = scmp.ne.s32.totalorder %s1627_s15, %s1623_s30  ;;  %p52_p9 = scmp.eq.s32.totalorder %s1631_s16, 0 }
  0x2d   : > { %p57_p10 = scmp.ne.s32.totalorder %s1623_s30, %s1619_s29  ;;  %p333_p13 = scmp.eq.s32.totalorder %s1742_s20, 1 }
  0x2e   : > { %s1818_s26 = scalar_select %p42_p7, %s1627_s15, %s44_s24  }
  0x2f   : > { %p1820_p11 = por %p52_p9, %p51_p8  ;;  %p1826_p12 = por %p58_p1, %p57_p10 }
  0x30   : > { %2014 = sst [smem:[#allocation23_spill]] %s1818_s26  ;;  %p339_p0 = scmp.eq.s32.totalorder %s1124_s19, 1 }
  0x31   : > { %p1255_p2 = scmp.lt.s32.totalorder %s1631_s16, 2  ;;  %s487_s25 = sand.u32 1, %s1627_s15  }
  0x32   : > { %p1833_p4 = por %p333_p13, %p51_p8  ;;  %p1837_p6 = por %p339_p0, %p57_p10 }
  0x33   : > { %s1133_s28 = sshll.u32 %s487_s25, 5  ;;  %s1154_s22 = sshll.u32 %s1631_s16, 5 }
  0x34   : > { %s496_s13 = scalar_lea.hbm %s1980_s0, %s1154_s22  ;;  %s491_s12 = scalar_lea.vmem [#allocation2], %s1133_s28 }
  0x35   : > { %s499_s3 = sshll.u32 %s491_s12, 4  ;;  %s497_s7 = sshll.u32 %s496_s13, 4  ;;  %s500_s3 = int_to_ptr.vmem [resolvable:$true] %s499_s3  ;;  %s498_s7 = int_to_ptr.hbm [resolvable:$true] %s497_s7 }
  0x36   : > { %p1847_p7 = pnand %p1255_p2, %p1820_p11  ;;  %s488_s9 = scalar_lea.sflag [#allocation3], %s487_s25 }
  0x37   : > { %s1491_s11 = sshra.s32 %s498_s7, 4  ;;  %s1498_s13 = scalar_lea.hbm %s1980_s0, 64  ;;  %s1492_s11 = int_to_ptr.hbm [resolvable:$true] %s1491_s11 }
  0x38   : > { %s1493_s26 = scalar_lea.hbm %s1492_s11, 32  ;;  %p1495_p9 = pneg %p1847_p7 }
  0x39   : > { %p1494_p8 = scmp.ne.s32.totalorder %s1492_s11, %s1493_s26  ;;  %p1499_p11 = scmp.lt.s32.totalorder %s1492_s11, %s1980_s0 }
  0x3a   : > { %p1500_p0 = scmp.lt.s32.totalorder %s1498_s13, %s1493_s26 }
  0x3b   : > { %p1496_p10 = pnand %p1495_p9, %p1494_p8 }
  0x3c   : > { %p1501_p2 = por %p1500_p0, %p1499_p11 }
  0x3d   : > { %p1497_p13 = pneg %p1496_p10 }
  0x3f   : > { %p1502_p5 = pnand %p1501_p2, %p1497_p13 }
  0x41   : > { %1505 = shalt.err (!%p1502_p5)
}
  0x42   : > { %s2020_s25 = smov 8   ;;  %s2021_s1 = smov 128  }
  0x43   : > { %1241 = dma.hbm_to_vmem [thread:$0]  (!%p1847_p7), %s498_s7, 512, %s500_s3, %s488_s9, %s2021_s1, %s2021_s1, %s2020_s25  }
  0x44   : > { %511 = sbr.rel (%p1747_p3) target bundleno = 939 (0x3ab), region = 72  ;;  %s1867_s24 = sand.u32 (!%p1747_p3), 1, %s1623_s30  }
  0x45   : > { %s1870_s11 = sshll.u32 (!%p1747_p3), %s1867_s24, 5  ;;  %s514_s26 = scalar_lea.sflag (!%p1747_p3), [#allocation3], %s1867_s24 }
  0x46   : > { %s1874_s28 = scalar_lea.vmem (!%p1747_p3), [#allocation2], %s1870_s11 }
  0x49   : > { %1594 = dma.done.wait (%p1826_p12), %s514_s26, 512  }
  0x4a   : > { %1596 = vsyncadd (%p1826_p12), %s514_s26, 4294966784 }
  0x4b   : > { %1598 = dma.done.wait (%p58_p1), [#allocation6], 4096  }
  0x4c   : > { %1600 = vsyncadd (%p58_p1), [#allocation6], 4294963200 }
  0x4d   : > { %1602 = dma.done.wait (%p58_p1), [#allocation9], 4096  }
  0x4e   : > { %1604 = vsyncadd (%p58_p1), [#allocation9], 4294963200 }
  0x4f   : > { %1606 = dma.done.wait (%p58_p1), [#allocation12], 4096  }
  0x50   : > { %1608 = vsyncadd (%p58_p1), [#allocation12], 4294963200  ;;  %v620_v0 = vld [vmem:[#allocation5 + $0x78] sm:$0xff]  ;;  %v619_v1 = vld [vmem:[#allocation5 + $0x70] sm:$0xff]  ;;  %s1906_s12 = scalar_lea.vmem [#allocation15], %s1870_s11  ;;  %s1155_s26 = sshll.u32 %s1742_s20, 5 }
  0x51   : > { %625 = vmatpush.msra.mxu0 %v620_v0  ;;  %v618_v2 = vld [vmem:[#allocation5 + $0x68] sm:$0xff]  ;;  %v617_v3 = vld [vmem:[#allocation5 + $0x60] sm:$0xff]  ;;  %v616_v4 = vld [vmem:[#allocation5 + $0x58] sm:$0xff]  ;;  %s958_s1 = sshll.u32 %s1906_s12, 4  ;;  %s957_s7 = scalar_lea.hbm %s1994_s14, %s1155_s26  ;;  %s959_s1 = int_to_ptr.vmem [resolvable:$true] %s958_s1 }
  0x52   : > { %v615_v5 = vld [vmem:[#allocation5 + $0x50] sm:$0xff]  ;;  %v614_v6 = vld [vmem:[#allocation5 + $0x48] sm:$0xff]  ;;  %v613_v7 = vld [vmem:[#allocation5 + $0x40] sm:$0xff]  ;;  %s960_s9 = sshll.u32 %s957_s7, 4  ;;  %s929_s21 = scalar_lea.sflag [#allocation16], %s1867_s24  ;;  %s961_s9 = int_to_ptr.hbm [resolvable:$true] %s960_s9 }
  0x53   : > { %626 = vmatpush.msra.mxu0 %v619_v1  ;;  %v612_v8 = vld [vmem:[#allocation5 + $0x38] sm:$0xff]  ;;  %v611_v9 = vld [vmem:[#allocation5 + $0x30] sm:$0xff]  ;;  %v610_v10 = vld [vmem:[#allocation5 + $0x28] sm:$0xff]  ;;  %s1535_s18 = sshra.s32 %s961_s9, 4  ;;  %s1536_s18 = int_to_ptr.hbm [resolvable:$true] %s1535_s18 }
  0x54   : > { %v609_v11 = vld [vmem:[#allocation5 + $0x20] sm:$0xff]  ;;  %v608_v12 = vld [vmem:[#allocation5 + $0x18] sm:$0xff]  ;;  %v607_v13 = vld [vmem:[#allocation5 + $0x10] sm:$0xff]  ;;  %s1537_s19 = scalar_lea.hbm %s1536_s18, 32  ;;  %p1542_p12 = scmp.lt.s32.totalorder %s1536_s18, %s1994_s14 }
  0x55   : > { %627 = vmatpush.msra.mxu0 %v618_v2  ;;  %v673_v14 = vld [vmem:[#allocation7 + $0x78] sm:$0xff]  ;;  %v672_v15 = vld [vmem:[#allocation7 + $0x70] sm:$0xff]  ;;  %v606_v16 = vld [vmem:[#allocation5 + $0x8] sm:$0xff]  ;;  %p1538_p1 = scmp.ne.s32.totalorder %s1536_s18, %s1537_s19 }
  0x56   : > { %678 = vmatpush.msra.mxu1 %v673_v14  ;;  %v671_v17 = vld [vmem:[#allocation7 + $0x68] sm:$0xff]  ;;  %v605_v18 = vld [vmem:[#allocation5] sm:$0xff]  ;;  %v669_v21 = vld [vmem:[#allocation7 + $0x58] sm:$0xff] }
  0x57   : > { %628 = vmatpush.msra.mxu0 %v617_v3  ;;  %v670_v19 = vld [vmem:[#allocation7 + $0x60] sm:$0xff]  ;;  %v668_v22 = vld [vmem:[#allocation7 + $0x50] sm:$0xff]  ;;  %v667_v23 = vld [vmem:[#allocation7 + $0x48] sm:$0xff]  ;;  %p1539_p3 = pnand %p1538_p1, %p1833_p4 }
  0x58   : > { %679 = vmatpush.msra.mxu1 %v672_v15  ;;  %v601_v20 = vld [vmem:[%s1874_s28] sm:$0xff]  ;;  %v602_v25 = vld [vmem:[%s1874_s28 + $0x8] sm:$0xff]  ;;  %v665_v26 = vld [vmem:[#allocation7 + $0x38] sm:$0xff] }
  0x59   : > { %629 = vmatpush.msra.mxu0 %v616_v4  ;;  %v666_v24 = vld [vmem:[#allocation7 + $0x40] sm:$0xff]  ;;  %v664_v27 = vld [vmem:[#allocation7 + $0x30] sm:$0xff]  ;;  %v663_v28 = vld [vmem:[#allocation7 + $0x28] sm:$0xff]  ;;  %p1540_p5 = pneg %p1539_p3 }
  0x5a   : > { %680 = vmatpush.msra.mxu1 %v671_v17  ;;  %v662_v29 = vld [vmem:[#allocation7 + $0x20] sm:$0xff]  ;;  %v603_v30 = vld [vmem:[%s1874_s28 + $0x10] sm:$0xff]  ;;  %v661_v31 = vld [vmem:[#allocation7 + $0x18] sm:$0xff] }
  0x5b   : > { %630 = vmatpush.msra.mxu0 %v615_v5  ;;  %v604_v32 = vld [vmem:[%s1874_s28 + $0x18] sm:$0xff]  ;;  %v660_v33 = vld [vmem:[#allocation7 + $0x10] sm:$0xff]  ;;  %v659_v34 = vld [vmem:[#allocation7 + $0x8] sm:$0xff] }
  0x5c   : > { %681 = vmatpush.msra.mxu1 %v670_v19  ;;  %v658_v35 = vld [vmem:[#allocation7] sm:$0xff]  ;;  %v726_v37 = vld [vmem:[#allocation8 + $0x78] sm:$0xff]  ;;  %v725_v38 = vld [vmem:[#allocation8 + $0x70] sm:$0xff] }
  0x5d   : > { %631 = vmatpush.msra.mxu0 %v614_v6  ;;  %v1305_v36 = vld [vmem:[%s1982_s2] ss:$0 sm:$0xff]  ;;  %731 = vmatpush.msra.mxu2 %v726_v37  ;;  %v724_v39 = vld [vmem:[#allocation8 + $0x68] sm:$0xff]  ;;  %v722_v44 = vld [vmem:[#allocation8 + $0x58] sm:$0xff] }
  0x5e   : > { %682 = vmatpush.msra.mxu1 %v669_v21  ;;  %v723_v42 = vld [vmem:[#allocation8 + $0x60] sm:$0xff]  ;;  %v721_v45 = vld [vmem:[#allocation8 + $0x50] sm:$0xff]  ;;  %v720_v46 = vld [vmem:[#allocation8 + $0x48] sm:$0xff] }
  0x5f   : > { %632 = vmatpush.msra.mxu0 %v613_v7  ;;  %732 = vmatpush.msra.mxu2 %v725_v38  ;;  %v719_v49 = vld [vmem:[#allocation8 + $0x40] sm:$0xff]  ;;  %v718_v51 = vld [vmem:[#allocation8 + $0x38] sm:$0xff]  ;;  %v717_v52 = vld [vmem:[#allocation8 + $0x30] sm:$0xff] }
  0x60   : > { %683 = vmatpush.msra.mxu1 %v668_v22  ;;  %v716_v53 = vld [vmem:[#allocation8 + $0x28] sm:$0xff]  ;;  %v715_v56 = vld [vmem:[#allocation8 + $0x20] sm:$0xff]  ;;  %v714_v58 = vld [vmem:[#allocation8 + $0x18] sm:$0xff] }
  0x61   : > { %633 = vmatpush.msra.mxu0 %v612_v8  ;;  %733 = vmatpush.msra.mxu2 %v724_v39  ;;  %v713_v62 = vld [vmem:[#allocation8 + $0x10] sm:$0xff]  ;;  %v712_v63 = vld [vmem:[#allocation8 + $0x8] sm:$0xff]  ;;  %v711_v0 = vld [vmem:[#allocation8] sm:$0xff] }
  0x62   : > { %684 = vmatpush.msra.mxu1 %v667_v23  ;;  %v1306_v1 = vld [vmem:[%s1984_s4] ss:$0 sm:$0xff]  ;;  %v779_v2 = vld [vmem:[#allocation10 + $0x78] sm:$0xff]  ;;  %v778_v3 = vld [vmem:[#allocation10 + $0x70] sm:$0xff] }
  0x63   : > { %634 = vmatpush.msra.mxu0 %v611_v9  ;;  %734 = vmatpush.msra.mxu2 %v723_v42  ;;  %v777_v4 = vld [vmem:[#allocation10 + $0x68] sm:$0xff]  ;;  %v776_v7 = vld [vmem:[#allocation10 + $0x60] sm:$0xff]  ;;  %v775_v9 = vld [vmem:[#allocation10 + $0x58] sm:$0xff] }
  0x64   : > { %685 = vmatpush.msra.mxu1 %v666_v24  ;;  %784 = vmatpush.msra.mxu3 %v779_v2  ;;  %v772_v14 = vld [vmem:[#allocation10 + $0x40] sm:$0xff]  ;;  %v770_v17 = vld [vmem:[#allocation10 + $0x30] sm:$0xff]  ;;  %v767_v23 = vld [vmem:[#allocation10 + $0x18] sm:$0xff] }
  0x65   : > { %635 = vmatpush.msra.mxu0 %v610_v10  ;;  %735 = vmatpush.msra.mxu2 %v722_v44  ;;  %v774_v10 = vld [vmem:[#allocation10 + $0x50] sm:$0xff]  ;;  %v768_v21 = vld [vmem:[#allocation10 + $0x20] sm:$0xff]  ;;  %v828_v37 = vld [vmem:[#allocation11 + $0x58] sm:$0xff] }
  0x66   : > { %686 = vmatpush.msra.mxu1 %v665_v26  ;;  %785 = vmatpush.msra.mxu3 %v778_v3  ;;  %v766_v24 = vld [vmem:[#allocation10 + $0x10] sm:$0xff]  ;;  %v826_v39 = vld [vmem:[#allocation11 + $0x48] sm:$0xff] }
  0x67   : > { %636 = vmatpush.msra.mxu0 %v609_v11  ;;  %736 = vmatpush.msra.mxu2 %v721_v45  ;;  %v773_v11 = vld [vmem:[#allocation10 + $0x48] sm:$0xff]  ;;  %v827_v38 = vld [vmem:[#allocation11 + $0x50] sm:$0xff] }
  0x68   : > { %687 = vmatpush.msra.mxu1 %v664_v27  ;;  %786 = vmatpush.msra.mxu3 %v777_v4  ;;  %v823_v44 = vld [vmem:[#allocation11 + $0x30] sm:$0xff]  ;;  %v822_v45 = vld [vmem:[#allocation11 + $0x28] sm:$0xff]  ;;  %v878_v4 = vld [vmem:[#allocation13 + $0x40] sm:$0xff] }
  0x69   : > { %637 = vmatpush.msra.mxu0 %v608_v12  ;;  %737 = vmatpush.msra.mxu2 %v720_v46  ;;  %v821_v46 = vld [vmem:[#allocation11 + $0x20] sm:$0xff] }
  0x6a   : > { %688 = vmatpush.msra.mxu1 %v663_v28  ;;  %787 = vmatpush.msra.mxu3 %v776_v7  ;;  %v765_v28 = vld [vmem:[#allocation10 + $0x8] sm:$0xff]  ;;  %v876_v7 = vld [vmem:[#allocation13 + $0x30] sm:$0xff] }
  0x6b   : > { %638 = vmatpush.msra.mxu0 %v607_v13  ;;  %738 = vmatpush.msra.mxu2 %v719_v49  ;;  %v820_v49 = vld [vmem:[#allocation11 + $0x18] sm:$0xff] }
  0x6c   : > { %689 = vmatpush.msra.mxu1 %v662_v29  ;;  %788 = vmatpush.msra.mxu3 %v775_v9  ;;  %v764_v29 = vld [vmem:[#allocation10] sm:$0xff] }
  0x6d   : > { %639 = vmatpush.msra.mxu0 %v606_v16  ;;  %739 = vmatpush.msra.mxu2 %v718_v51  ;;  %v771_v16 = vld [vmem:[#allocation10 + $0x38] sm:$0xff] }
  0x6e   : > { %690 = vmatpush.msra.mxu1 %v661_v31  ;;  %789 = vmatpush.msra.mxu3 %v774_v10  ;;  %v831_v31 = vld [vmem:[#allocation11 + $0x70] sm:$0xff] }
  0x6f   : > { %640 = vmatpush.msra.mxu0 %v605_v18  ;;  %740 = vmatpush.msra.mxu2 %v717_v52  ;;  %v769_v18 = vld [vmem:[#allocation10 + $0x28] sm:$0xff]  ;;  %v819_v52 = vld [vmem:[#allocation11 + $0x10] sm:$0xff] }
  0x70   : > { %641 = vmatmul.f32.vlgmr.msra.gmra.mxu0 %v601_v20  ;;  %691 = vmatpush.msra.mxu1 %v660_v33  ;;  %v830_v33 = vld [vmem:[#allocation11 + $0x68] sm:$0xff] }
  0x71   : > { %741 = vmatpush.msra.mxu2 %v716_v53  ;;  %790 = vmatpush.msra.mxu3 %v773_v11  ;;  %v818_v53 = vld [vmem:[#allocation11 + $0x8] sm:$0xff]  ;;  %v874_v11 = vld [vmem:[#allocation13 + $0x20] sm:$0xff] }
  0x72   : > { %692 = vmatpush.msra.mxu1 %v659_v34  ;;  %v829_v34 = vld [vmem:[#allocation11 + $0x60] sm:$0xff] }
  0x73   : > { %742 = vmatpush.msra.mxu2 %v715_v56  ;;  %791 = vmatpush.msra.mxu3 %v772_v14  ;;  %v885_v56 = vld [vmem:[#allocation13 + $0x78] sm:$0xff] }
  0x74   : > { %693 = vmatpush.msra.mxu1 %v658_v35 }
  0x75   : > { %743 = vmatpush.msra.mxu2 %v714_v58  ;;  %792 = vmatpush.msra.mxu3 %v771_v16  ;;  %v883_v58 = vld [vmem:[#allocation13 + $0x68] sm:$0xff] }
  0x76   : > { %890 = vmatpush.msrb.mxu1 %v885_v56 }
  0x77   : > { %744 = vmatpush.msra.mxu2 %v713_v62  ;;  %793 = vmatpush.msra.mxu3 %v770_v17  ;;  %v872_v17 = vld [vmem:[#allocation13 + $0x10] sm:$0xff] }
  0x78   : > { %644 = vmatmul.f32.gmra.mxu0 %v602_v25 }
  0x79   : > { %745 = vmatpush.msra.mxu2 %v712_v63  ;;  %794 = vmatpush.msra.mxu3 %v769_v18  ;;  %v881_v63 = vld [vmem:[#allocation13 + $0x58] sm:$0xff]  ;;  %v871_v18 = vld [vmem:[#allocation13 + $0x8] sm:$0xff] }
  0x7b   : > { %746 = vmatpush.msra.mxu2 %v711_v0  ;;  %795 = vmatpush.msra.mxu3 %v768_v21  ;;  %v880_v0 = vld [vmem:[#allocation13 + $0x50] sm:$0xff] }
  0x7d   : > { %796 = vmatpush.msra.mxu3 %v767_v23 }
  0x7f   : > { %797 = vmatpush.msra.mxu3 %v766_v24 }
  0x80   : > { %647 = vmatmul.f32.gmra.mxu0 %v603_v30  ;;  %v832_v30 = vld [vmem:[#allocation11 + $0x78] sm:$0xff] }
  0x81   : > { %798 = vmatpush.msra.mxu3 %v765_v28  ;;  %837 = vmatpush.msrb.mxu0 %v832_v30 }
  0x82   : > { %1157 = vmatpush.msrb.mxu2 %v832_v30 }
  0x83   : > { %799 = vmatpush.msra.mxu3 %v764_v29  ;;  %838 = vmatpush.msrb.mxu0 %v831_v31 }
  0x84   : > { %1158 = vmatpush.msrb.mxu2 %v831_v31 }
  0x85   : > { %839 = vmatpush.msrb.mxu0 %v830_v33  ;;  %1173 = vmatpush.msrb.mxu3 %v885_v56 }
  0x86   : > { %1159 = vmatpush.msrb.mxu2 %v830_v33 }
  0x87   : > { %840 = vmatpush.msrb.mxu0 %v829_v34 }
  0x88   : > { %650 = vmatmul.f32.gmra.mxu0 %v604_v32  ;;  %v1307_v32 = vld [vmem:[%s1986_s6] ss:$0 sm:$0xff]  ;;  %1160 = vmatpush.msrb.mxu2 %v829_v34 }
  0x89   : > { %841 = vmatpush.msrb.mxu0 %v828_v37 }
  0x8a   : > { %1161 = vmatpush.msrb.mxu2 %v828_v37 }
  0x8b   : > { %842 = vmatpush.msrb.mxu0 %v827_v38 }
  0x8c   : > { %1162 = vmatpush.msrb.mxu2 %v827_v38 }
  0x8d   : > { %843 = vmatpush.msrb.mxu0 %v826_v39 }
  0x8e   : > { %1163 = vmatpush.msrb.mxu2 %v826_v39 }
  0xed   : > { %v642_v40 = vpop.f32.mrf.mxu0 }
  0xee   : > { %v643_v41 = vadd.f32 %v1305_v36, %v642_v40  ;;  %v825_v40 = vld [vmem:[#allocation11 + $0x40] sm:$0xff] }
  0xef   : > { %844 = vmatpush.msrb.mxu0 %v825_v40  ;;  %1164 = vmatpush.msrb.mxu2 %v825_v40 }
  0xf0   : > { %v654_v43 = vmax.f32 %v643_v41, 0.0 }
  0xf2   : > { %694 = vmatmul.f32.vlgmr.msra.gmra.mxu1 %v654_v43  ;;  %v824_v43 = vld [vmem:[#allocation11 + $0x38] sm:$0xff] }
  0xf3   : > { %845 = vmatpush.msrb.mxu0 %v824_v43  ;;  %1165 = vmatpush.msrb.mxu2 %v824_v43 }
  0xf5   : > { %v645_v47 = vpop.f32.mrf.mxu0  ;;  %846 = vmatpush.msrb.mxu0 %v823_v44  ;;  %1166 = vmatpush.msrb.mxu2 %v823_v44 }
  0xf6   : > { %v646_v48 = vadd.f32 %v1305_v36, %v645_v47 }
  0xf7   : > { %847 = vmatpush.msrb.mxu0 %v822_v45  ;;  %1167 = vmatpush.msrb.mxu2 %v822_v45 }
  0xf8   : > { %v655_v50 = vmax.f32 %v646_v48, 0.0 }
  0xf9   : > { %848 = vmatpush.msrb.mxu0 %v821_v46  ;;  %1168 = vmatpush.msrb.mxu2 %v821_v46 }
  0xfa   : > { %697 = vmatmul.f32.gmra.mxu1 %v655_v50 }
  0xfb   : > { %849 = vmatpush.msrb.mxu0 %v820_v49  ;;  %1169 = vmatpush.msrb.mxu2 %v820_v49 }
  0xfd   : > { %v648_v54 = vpop.f32.mrf.mxu0  ;;  %850 = vmatpush.msrb.mxu0 %v819_v52  ;;  %1170 = vmatpush.msrb.mxu2 %v819_v52 }
  0xfe   : > { %v649_v55 = vadd.f32 %v1305_v36, %v648_v54  ;;  %v817_v54 = vld [vmem:[#allocation11] sm:$0xff] }
  0xff   : > { %851 = vmatpush.msrb.mxu0 %v818_v53  ;;  %1171 = vmatpush.msrb.mxu2 %v818_v53 }
 0x100   : > { %v656_v57 = vmax.f32 %v649_v55, 0.0  ;;  %v1308_v55 = vld [vmem:[%s1988_s8] ss:$0 sm:$0xff] }
 0x101   : > { %852 = vmatpush.msrb.mxu0 %v817_v54  ;;  %1172 = vmatpush.msrb.mxu2 %v817_v54 }
 0x102   : > { %700 = vmatmul.f32.gmra.mxu1 %v656_v57  ;;  %v884_v57 = vld [vmem:[#allocation13 + $0x70] sm:$0xff] }
 0x103   : > { %891 = vmatpush.msrb.mxu1 %v884_v57  ;;  %1174 = vmatpush.msrb.mxu3 %v884_v57 }
 0x105   : > { %v651_v59 = vpop.f32.mrf.mxu0  ;;  %892 = vmatpush.msrb.mxu1 %v883_v58  ;;  %1175 = vmatpush.msrb.mxu3 %v883_v58 }
 0x106   : > { %v652_v60 = vadd.f32 %v1305_v36, %v651_v59 }
 0x108   : > { %v657_v61 = vmax.f32 %v652_v60, 0.0 }
 0x10a   : > { %703 = vmatmul.f32.gmra.mxu1 %v657_v61  ;;  %v882_v61 = vld [vmem:[#allocation13 + $0x60] sm:$0xff] }
 0x10b   : > { %893 = vmatpush.msrb.mxu1 %v882_v61  ;;  %1176 = vmatpush.msrb.mxu3 %v882_v61 }
 0x10d   : > { %894 = vmatpush.msrb.mxu1 %v881_v63  ;;  %1177 = vmatpush.msrb.mxu3 %v881_v63 }
 0x10f   : > { %895 = vmatpush.msrb.mxu1 %v880_v0  ;;  %1178 = vmatpush.msrb.mxu3 %v880_v0 }
 0x16f   : > { %v695_v5 = vpop.f32.mrf.mxu1 }
 0x170   : > { %v696_v6 = vadd.f32 %v1306_v1, %v695_v5 }
 0x172   : > { %v707_v8 = vmax.f32 %v696_v6, 0.0  ;;  %v877_v6 = vld [vmem:[#allocation13 + $0x38] sm:$0xff] }
 0x174   : > { %747 = vmatmul.f32.vlgmr.msra.gmra.mxu2 %v707_v8  ;;  %v875_v8 = vld [vmem:[#allocation13 + $0x28] sm:$0xff] }
 0x177   : > { %v698_v12 = vpop.f32.mrf.mxu1 }
 0x178   : > { %v699_v13 = vadd.f32 %v1306_v1, %v698_v12 }
 0x17a   : > { %v708_v15 = vmax.f32 %v699_v13, 0.0  ;;  %v873_v13 = vld [vmem:[#allocation13 + $0x18] sm:$0xff] }
 0x17c   : > { %750 = vmatmul.f32.gmra.mxu2 %v708_v15 }
 0x17f   : > { %v701_v19 = vpop.f32.mrf.mxu1 }
 0x180   : > { %v702_v20 = vadd.f32 %v1306_v1, %v701_v19  ;;  %v870_v19 = vld [vmem:[#allocation13] sm:$0xff] }
 0x182   : > { %v709_v22 = vmax.f32 %v702_v20, 0.0  ;;  %v1309_v20 = vld [vmem:[%s1990_s10] ss:$0 sm:$0xff] }
 0x184   : > { %753 = vmatmul.f32.gmra.mxu2 %v709_v22 }
 0x187   : > { %v704_v25 = vpop.f32.mrf.mxu1 }
 0x188   : > { %v705_v26 = vadd.f32 %v1306_v1, %v704_v25  ;;  %v879_v1 = vld [vmem:[#allocation13 + $0x48] sm:$0xff] }
 0x189   : > { %896 = vmatpush.msrb.mxu1 %v879_v1  ;;  %1179 = vmatpush.msrb.mxu3 %v879_v1 }
 0x18a   : > { %v710_v27 = vmax.f32 %v705_v26, 0.0 }
 0x18b   : > { %897 = vmatpush.msrb.mxu1 %v878_v4  ;;  %1180 = vmatpush.msrb.mxu3 %v878_v4 }
 0x18c   : > { %756 = vmatmul.f32.gmra.mxu2 %v710_v27 }
 0x18d   : > { %898 = vmatpush.msrb.mxu1 %v877_v6  ;;  %1181 = vmatpush.msrb.mxu3 %v877_v6 }
 0x18f   : > { %899 = vmatpush.msrb.mxu1 %v876_v7  ;;  %1182 = vmatpush.msrb.mxu3 %v876_v7 }
 0x191   : > { %900 = vmatpush.msrb.mxu1 %v875_v8  ;;  %1183 = vmatpush.msrb.mxu3 %v875_v8 }
 0x193   : > { %901 = vmatpush.msrb.mxu1 %v874_v11  ;;  %1184 = vmatpush.msrb.mxu3 %v874_v11 }
 0x195   : > { %902 = vmatpush.msrb.mxu1 %v873_v13  ;;  %1185 = vmatpush.msrb.mxu3 %v873_v13 }
 0x197   : > { %903 = vmatpush.msrb.mxu1 %v872_v17  ;;  %1186 = vmatpush.msrb.mxu3 %v872_v17 }
 0x199   : > { %904 = vmatpush.msrb.mxu1 %v871_v18  ;;  %1187 = vmatpush.msrb.mxu3 %v871_v18 }
 0x19b   : > { %905 = vmatpush.msrb.mxu1 %v870_v19  ;;  %1188 = vmatpush.msrb.mxu3 %v870_v19 }
 0x1f7   : > { %v748_v35 = vpop.f32.mrf.mxu2 }
 0x1f8   : > { %v749_v36 = vadd.f32 %v1307_v32, %v748_v35 }
 0x1fa   : > { %760 = vst [vmem:[%s1906_s12] sm:$0xff] %v749_v36  ;;  %800 = vmatmul.f32.vlgmr.msra.gmra.mxu3 %v749_v36 }
 0x1ff   : > { %v751_v41 = vpop.f32.mrf.mxu2 }
 0x200   : > { %v752_v42 = vadd.f32 %v1307_v32, %v751_v41 }
 0x202   : > { %761 = vst [vmem:[%s1906_s12 + $0x8] sm:$0xff] %v752_v42  ;;  %803 = vmatmul.f32.gmra.mxu3 %v752_v42 }
 0x207   : > { %v754_v47 = vpop.f32.mrf.mxu2 }
 0x208   : > { %v755_v48 = vadd.f32 %v1307_v32, %v754_v47 }
 0x20a   : > { %762 = vst [vmem:[%s1906_s12 + $0x10] sm:$0xff] %v755_v48  ;;  %806 = vmatmul.f32.gmra.mxu3 %v755_v48 }
 0x20f   : > { %v757_v50 = vpop.f32.mrf.mxu2 }
 0x210   : > { %v758_v51 = vadd.f32 %v1307_v32, %v757_v50 }
 0x212   : > { %763 = vst [vmem:[%s1906_s12 + $0x18] sm:$0xff] %v758_v51  ;;  %809 = vmatmul.f32.gmra.mxu3 %v758_v51  ;;  %s1541_s12 = scalar_lea.hbm %s1994_s14, 64 }
 0x213   : > { %p1543_p7 = scmp.lt.s32.totalorder %s1541_s12, %s1537_s19 }
 0x215   : > { %p1544_p8 = por %p1543_p7, %p1542_p12 }
 0x217   : > { %p1545_p9 = pnand %p1544_p8, %p1540_p5 }
 0x27d   : > { %v801_v59 = vpop.f32.mrf.mxu3 }
 0x27e   : > { %v802_v60 = vadd.f32 %v1308_v55, %v801_v59 }
 0x280   : > { %v813_v62 = vmax.f32 %v802_v60, 0.0 }
 0x282   : > { %853 = vmatmul.f32.vlgmr.msrb.gmra.mxu0 %v813_v62 }
 0x285   : > { %v804_v2 = vpop.f32.mrf.mxu3 }
 0x286   : > { %v805_v3 = vadd.f32 %v1308_v55, %v804_v2 }
 0x288   : > { %v814_v5 = vmax.f32 %v805_v3, 0.0 }
 0x28a   : > { %856 = vmatmul.f32.gmra.mxu0 %v814_v5 }
 0x28d   : > { %v807_v9 = vpop.f32.mrf.mxu3 }
 0x28e   : > { %v808_v10 = vadd.f32 %v1308_v55, %v807_v9 }
 0x290   : > { %v815_v12 = vmax.f32 %v808_v10, 0.0 }
 0x292   : > { %859 = vmatmul.f32.vlgmr.msrb.gmra.mxu2 %v815_v12 }
 0x295   : > { %v810_v14 = vpop.f32.mrf.mxu3 }
 0x296   : > { %v811_v15 = vadd.f32 %v1308_v55, %v810_v14 }
 0x298   : > { %v816_v16 = vmax.f32 %v811_v15, 0.0 }
 0x29a   : > { %862 = vmatmul.f32.gmra.mxu2 %v816_v16 }
 0x2ff   : > { %v854_v21 = vpop.f32.mrf.mxu0 }
 0x300   : > { %v855_v22 = vadd.f32 %v1309_v20, %v854_v21 }
 0x302   : > { %v866_v23 = vmax.f32 %v855_v22, 0.0 }
 0x304   : > { %906 = vmatmul.f32.vlgmr.msrb.gmra.mxu1 %v866_v23 }
 0x307   : > { %v857_v24 = vpop.f32.mrf.mxu0 }
 0x308   : > { %v858_v25 = vadd.f32 %v1309_v20, %v857_v24 }
 0x30a   : > { %v867_v26 = vmax.f32 %v858_v25, 0.0 }
 0x30c   : > { %909 = vmatmul.f32.gmra.mxu1 %v867_v26 }
 0x315   : > { %v860_v27 = vpop.f32.mrf.mxu2 }
 0x316   : > { %v861_v28 = vadd.f32 %v1309_v20, %v860_v27 }
 0x318   : > { %v868_v29 = vmax.f32 %v861_v28, 0.0 }
 0x31a   : > { %912 = vmatmul.f32.vlgmr.msrb.gmra.mxu3 %v868_v29 }
 0x31d   : > { %v863_v30 = vpop.f32.mrf.mxu2 }
 0x31e   : > { %v864_v31 = vadd.f32 %v1309_v20, %v863_v30 }
 0x320   : > { %v869_v32 = vmax.f32 %v864_v31, 0.0 }
 0x322   : > { %915 = vmatmul.f32.gmra.mxu3 %v869_v32 }
 0x323   : > { %1548 = shalt.err (!%p1545_p9)
}
 0x324   : > { %s1641_s28 = smov 128   ;;  %s1642_s3 = smov 8  }
 0x325   : > { %1216 = dma.vmem_to_hbm [thread:$0]  (%p1833_p4), %s959_s1, 512, %s961_s9, %s929_s21, %s1641_s28, %s1641_s28, %s1642_s3  }
 0x326   : > { %s2022_s22 = sld [smem:[#allocation30_spill]]  ;;  %s590_s18 = scalar_lea.vmem [#allocation14], %s1870_s11 }
 0x327   : > { %s2023_s1 = sld [smem:[#allocation31_spill]]  ;;  %s941_s21 = sshll.u32 %s590_s18, 4  ;;  %s942_s21 = int_to_ptr.vmem [resolvable:$true] %s941_s21 }
 0x328   : > { %s924_s11 = scalar_lea.sflag [#allocation4], %s1867_s24 }
 0x32c   : > { %v1310_v33 = vld [vmem:[%s2022_s22] ss:$0 sm:$0xff] }
 0x32d   : > { %s940_s9 = scalar_lea.hbm %s2023_s1, %s1155_s26  ;;  %s1569_s22 = scalar_lea.hbm %s2023_s1, 64 }
 0x32e   : > { %s943_s27 = sshll.u32 %s940_s9, 4  ;;  %s944_s27 = int_to_ptr.hbm [resolvable:$true] %s943_s27 }
 0x32f   : > { %s1563_s25 = sshra.s32 %s944_s27, 4  ;;  %s1564_s25 = int_to_ptr.hbm [resolvable:$true] %s1563_s25 }
 0x330   : > { %s1565_s7 = scalar_lea.hbm %s1564_s25, 32  ;;  %p1570_p0 = scmp.lt.s32.totalorder %s1564_s25, %s2023_s1 }
 0x331   : > { %p1566_p10 = scmp.ne.s32.totalorder %s1564_s25, %s1565_s7  ;;  %p1571_p2 = scmp.lt.s32.totalorder %s1569_s22, %s1565_s7 }
 0x333   : > { %p1567_p13 = pnand %p1566_p10, %p1833_p4  ;;  %p1572_p1 = por %p1571_p2, %p1570_p0 }
 0x335   : > { %p1568_p11 = pneg %p1567_p13 }
 0x337   : > { %p1573_p3 = pnand %p1572_p1, %p1568_p11 }
 0x381   : > { %v907_v34 = vpop.f32.mrf.mxu1 }
 0x382   : > { %v908_v35 = vadd.f32 %v1310_v33, %v907_v34 }
 0x384   : > { %919 = vst [vmem:[%s590_s18] sm:$0xff] %v908_v35 }
 0x389   : > { %v910_v36 = vpop.f32.mrf.mxu1 }
 0x38a   : > { %v911_v37 = vadd.f32 %v1310_v33, %v910_v36 }
 0x38c   : > { %920 = vst [vmem:[%s590_s18 + $0x8] sm:$0xff] %v911_v37 }
 0x39d   : > { %v913_v38 = vpop.f32.mrf.mxu3 }
 0x39e   : > { %v914_v39 = vadd.f32 %v1310_v33, %v913_v38 }
 0x3a0   : > { %921 = vst [vmem:[%s590_s18 + $0x10] sm:$0xff] %v914_v39 }
 0x3a5   : > { %v916_v40 = vpop.f32.mrf.mxu3 }
 0x3a6   : > { %v917_v41 = vadd.f32 %v1310_v33, %v916_v40 }
 0x3a8   : > { %922 = vst [vmem:[%s590_s18 + $0x18] sm:$0xff] %v917_v41 }
 0x3a9   : > { %1576 = shalt.err (!%p1573_p3)
}
 0x3aa   : > { %1215 = dma.vmem_to_hbm [thread:$0]  (%p1833_p4), %s942_s21, 512, %s944_s27, %s924_s11, %s1641_s28, %s1641_s28, %s1642_s3  }
 0x3ab PF: > { %s975_s24 = sand.u32 1, %s1619_s29   ;;  %p2024_p5 = scmp.ge.s32.totalorder %s1631_s16, 2 }
 0x3ac   : > { %s976_s18 = scalar_lea.sflag [#allocation4], %s975_s24 }
 0x3ad   : > { %p1243_p12 = pnand %p2024_p5, %p1837_p6 }
 0x3af   : > { %p1244_p7 = pneg %p1243_p12 }
 0x3b1   : > { %1610 = dma.done.wait (%p1244_p7), %s976_s18, 512  }
 0x3b2   : > { %1612 = vsyncadd (%p1244_p7), %s976_s18, 4294966784  ;;  %s986_s12 = scalar_lea.sflag [#allocation16], %s975_s24 }
 0x3b3   : > { %1614 = dma.done.wait (%p1244_p7), %s986_s12, 512  }
 0x3b4   : > { %1616 = vsyncadd (%p1244_p7), %s986_s12, 4294966784  ;;  %s2025_s17 = sld [smem:[#allocation23_spill]]  ;;  %p34_p4 = scmp.ge.s32.totalorder %s1807_s23, 4  }
 0x3b5   : > { %s2026_s29 = smov %s1623_s30  ;;  %s2027_s30 = smov %s1627_s15 }
 0x3b6   : > { %s2029_s16 = smov %s1807_s23  ;;  %36 = sbr.rel (!%p34_p4) target bundleno = 19 (0x13), region = 158 }
 0x3ba   : > { %s2028_s15 = smov %s2025_s17 }
 0x3bb   :  { %992 = vsyncpa [#allocation3], 1 }
 0x3bc   :  { %994 = vsyncpa [#allocation3 + $0x1], 1 }
 0x3bd   :  { %995 = vsyncpa [#allocation6], 1 }
 0x3be   :  { %996 = vsyncpa [#allocation9], 1 }
 0x3bf   :  { %997 = vsyncpa [#allocation12], 1 }
 0x3c0   :  { %998 = vsyncpa [#allocation4], 1 }
 0x3c1   :  { %1000 = vsyncpa [#allocation4 + $0x1], 1 }
 0x3c2   :  { %1001 = vsyncpa [#allocation16], 1 }
 0x3c3   :  { %1003 = vsyncpa [#allocation16 + $0x1], 1 }

// kernel: tpu_custom_call.1
= control target key start
LH: loop header
LB: loop body
LE: loop exit
PB: predicated region body
PF: predicated region fallthrough
CT: control target
= control target key end

     0   :  { %s1980_s0 = inlined_call_operand.hbm [shape: f32[64,128], index: 0, kind: input, shape index: {}]   ;;  %s1981_s1 = inlined_call_operand.hbm [shape: f32[128,128], index: 1, kind: input, shape index: {}]   ;;  %s1982_s2 = inlined_call_operand.vmem [shape: f32[1,128], index: 2, kind: input, shape index: {}]   ;;  %s1983_s3 = inlined_call_operand.hbm [shape: f32[128,128], index: 3, kind: input, shape index: {}]   ;;  %s1984_s4 = inlined_call_operand.vmem [shape: f32[1,128], index: 4, kind: input, shape index: {}]   ;;  %s1985_s5 = inlined_call_operand.hbm [shape: f32[128,128], index: 5, kind: input, shape index: {}]   ;;  %s1986_s6 = inlined_call_operand.vmem [shape: f32[1,128], index: 6, kind: input, shape index: {}]   ;;  %s1987_s7 = inlined_call_operand.hbm [shape: f32[128,128], index: 7, kind: input, shape index: {}]   ;;  %s1988_s8 = inlined_call_operand.vmem [shape: f32[1,128], index: 8, kind: input, shape index: {}]   ;;  %s1989_s9 = inlined_call_operand.hbm [shape: f32[128,128], index: 9, kind: input, shape index: {}]   ;;  %s1990_s10 = inlined_call_operand.vmem [shape: f32[1,128], index: 10, kind: input, shape index: {}]   ;;  %s1991_s11 = inlined_call_operand.hbm [shape: f32[128,128], index: 11, kind: input, shape index: {}]   ;;  %s1992_s12 = inlined_call_operand.vmem [shape: f32[1,128], index: 12, kind: input, shape index: {}]   ;;  %s1993_s13 = inlined_call_operand.hbm [shape: f32[64,128], index: 13, kind: output, shape index: {0}]   ;;  %s1994_s14 = inlined_call_operand.hbm [shape: f32[64,128], index: 14, kind: output, shape index: {1}]  }
   0x1   :  { %1998 = sst [smem:[#allocation24_spill]] %s1981_s1 }
   0x2   :  { %1999 = sst [smem:[#allocation25_spill]] %s1983_s3 }
   0x3   :  { %2000 = sst [smem:[#allocation26_spill]] %s1985_s5 }
   0x4   :  { %2001 = sst [smem:[#allocation27_spill]] %s1987_s7 }
   0x5   :  { %2002 = sst [smem:[#allocation28_spill]] %s1989_s9 }
   0x6   :  { %2003 = sst [smem:[#allocation29_spill]] %s1991_s11 }
   0x7   :  { %2004 = sst [smem:[#allocation30_spill]] %s1992_s12 }
   0x8   :  { %2005 = sst [smem:[#allocation31_spill]] %s1993_s13 }
   0x9   :  { %20 = vsyncpa [#allocation3], 0 }
   0xa   :  { %22 = vsyncpa [#allocation3 + $0x1], 0 }
   0xb   :  { %23 = vsyncpa [#allocation6], 0 }
   0xc   :  { %24 = vsyncpa [#allocation9], 0 }
   0xd   :  { %25 = vsyncpa [#allocation12], 0 }
   0xe   :  { %26 = vsyncpa [#allocation4], 0 }
   0xf   :  { %28 = vsyncpa [#allocation4 + $0x1], 0 }
  0x10   :  { %29 = vsyncpa [#allocation16], 0 }
  0x11   :  { %31 = vsyncpa [#allocation16 + $0x1], 0  ;;  %s1718_s29 = smov 0   ;;  %s1720_s30 = smov 0  }
  0x12   :  { %s1722_s15 = smov 0   ;;  %s1724_s16 = smov 0  }
  0x13 LB: > { %s2006_s1 = sld [smem:[#allocation24_spill]]  ;;  %s1742_s20 = sadd.s32 4294967295, %s1631_s16   ;;  %s1631_s16 = sphi %s1724_s16, %s2029_s16   ;;  %s1627_s15 = sphi %s1722_s15, %s2028_s15   ;;  %s1623_s30 = sphi %s1720_s30, %s2027_s30   ;;  %s1619_s29 = sphi %s1718_s29, %s2026_s29  }
  0x14   : > { %p1125_p0 = scmp.ge.s32.totalorder %s1631_s16, 1  ;;  %p58_p1 = scmp.eq.s32.totalorder %s1742_s20, 0 }
  0x15   : > { %p372_p2 = scmp.lt.s32.totalorder %s1631_s16, 3  ;;  %s1633_s22 = smov [#allocation5]  }
  0x16   : > { %s385_s23 = sshll.u32 %s1633_s22, 4  ;;  %s2008_s5 = sld [smem:[#allocation26_spill]]  ;;  %s386_s23 = int_to_ptr.vmem [resolvable:$true] %s385_s23 }
  0x17   : > { %p1747_p3 = pnand %p1125_p0, %p372_p2  ;;  %s2010_s9 = sld [smem:[#allocation28_spill]] }
  0x18   : > { %s1634_s22 = smov [#allocation8]   ;;  %s1996_s13 = smov 128  }
  0x19   : > { %s383_s19 = sshll.u32 %s2006_s1, 4  ;;  %p1219_p4 = pneg %p1747_p3  ;;  %s384_s19 = int_to_ptr.hbm [resolvable:$true] %s383_s19 }
  0x1a   : > { %s419_s1 = sshll.u32 %s1634_s22, 4  ;;  %s1997_s12 = smov 8   ;;  %s420_s1 = int_to_ptr.vmem [resolvable:$true] %s419_s1 }
  0x1b   : > { %p1759_p6 = pnand %p1219_p4, %p58_p1  ;;  %s2011_s3 = sld [smem:[#allocation25_spill]] }
  0x1c   : > { %s417_s26 = sshll.u32 %s2008_s5, 4  ;;  %s1637_s17 = smov [#allocation11]   ;;  %s418_s26 = int_to_ptr.hbm [resolvable:$true] %s417_s26 }
  0x1d   : > { %s451_s18 = sshll.u32 %s2010_s9, 4  ;;  %s453_s22 = sshll.u32 %s1637_s17, 4  ;;  %s452_s18 = int_to_ptr.hbm [resolvable:$true] %s451_s18  ;;  %s454_s22 = int_to_ptr.vmem [resolvable:$true] %s453_s22 }
  0x1e   : > { %1222 = dma.hbm_to_vmem [thread:$0]  (!%p1759_p6), %s384_s19, 2048, %s386_s23, [#allocation6], %s1996_s13, %s1996_s13, %s1997_s12  }
  0x1f   : > { %1228 = dma.hbm_to_vmem [thread:$0]  (!%p1759_p6), %s418_s26, 2048, %s420_s1, [#allocation9], %s1996_s13, %s1996_s13, %s1997_s12  }
  0x20   : > { %1234 = dma.hbm_to_vmem [thread:$0]  (!%p1759_p6), %s452_s18, 2048, %s454_s22, [#allocation12], %s1996_s13, %s1996_s13, %s1997_s12  }
  0x21   : > { %s400_s28 = sshll.u32 %s2011_s3, 4  ;;  %s1638_s19 = smov [#allocation7]   ;;  %s401_s28 = int_to_ptr.hbm [resolvable:$true] %s400_s28 }
  0x22   : > { %s402_s23 = sshll.u32 %s1638_s19, 4  ;;  %s2012_s7 = sld [smem:[#allocation27_spill]]  ;;  %s403_s23 = int_to_ptr.vmem [resolvable:$true] %s402_s23 }
  0x23   : > { %1225 = dma.hbm_to_vmem [thread:$0]  (!%p1759_p6), %s401_s28, 2048, %s403_s23, [#allocation6], %s1996_s13, %s1996_s13, %s1997_s12  }
  0x24   : > { %s2013_s11 = sld [smem:[#allocation29_spill]]  ;;  %s1639_s17 = smov [#allocation10]  }
  0x25   : > { %s436_s5 = sshll.u32 %s1639_s17, 4  ;;  %s1640_s28 = smov [#allocation13]   ;;  %s437_s5 = int_to_ptr.vmem [resolvable:$true] %s436_s5 }
  0x26   : > { %s470_s22 = sshll.u32 %s1640_s28, 4  ;;  %s1124_s19 = sadd.s32 4294967294, %s1631_s16   ;;  %s471_s22 = int_to_ptr.vmem [resolvable:$true] %s470_s22 }
  0x27   : > { %s1807_s23 = sadd.s32 1, %s1631_s16   ;;  %s44_s24 = sadd.s32 1, %s1627_s15 }
  0x28   : > { %s434_s26 = sshll.u32 %s2012_s7, 4  ;;  %s41_s1 = ssub.s32 %s1631_s16, %s1807_s23  ;;  %s435_s26 = int_to_ptr.hbm [resolvable:$true] %s434_s26 }
  0x29   : > { %1231 = dma.hbm_to_vmem [thread:$0]  (!%p1759_p6), %s435_s26, 2048, %s437_s5, [#allocation9], %s1996_s13, %s1996_s13, %s1997_s12  }
  0x2a   : > { %s468_s25 = sshll.u32 %s2013_s11, 4  ;;  %p42_p7 = scmp.eq.s32.totalorder %s41_s1, 0  ;;  %s469_s25 = int_to_ptr.hbm [resolvable:$true] %s468_s25 }
  0x2b   : > { %1237 = dma.hbm_to_vmem [thread:$0]  (!%p1759_p6), %s469_s25, 2048, %s471_s22, [#allocation12], %s1996_s13, %s1996_s13, %s1997_s12  }
  0x2c   : > { %p51_p8 = scmp.ne.s32.totalorder %s1627_s15, %s1623_s30  ;;  %p52_p9 = scmp.eq.s32.totalorder %s1631_s16, 0 }
  0x2d   : > { %p57_p10 = scmp.ne.s32.totalorder %s1623_s30, %s1619_s29  ;;  %p333_p13 = scmp.eq.s32.totalorder %s1742_s20, 1 }
  0x2e   : > { %s1818_s26 = scalar_select %p42_p7, %s1627_s15, %s44_s24  }
  0x2f   : > { %p1820_p11 = por %p52_p9, %p51_p8  ;;  %p1826_p12 = por %p58_p1, %p57_p10 }
  0x30   : > { %2014 = sst [smem:[#allocation23_spill]] %s1818_s26  ;;  %p339_p0 = scmp.eq.s32.totalorder %s1124_s19, 1 }
  0x31   : > { %p1255_p2 = scmp.lt.s32.totalorder %s1631_s16, 2  ;;  %s487_s25 = sand.u32 1, %s1627_s15  }
  0x32   : > { %p1833_p4 = por %p333_p13, %p51_p8  ;;  %p1837_p6 = por %p339_p0, %p57_p10 }
  0x33   : > { %s1133_s28 = sshll.u32 %s487_s25, 5  ;;  %s1154_s22 = sshll.u32 %s1631_s16, 5 }
  0x34   : > { %s496_s13 = scalar_lea.hbm %s1980_s0, %s1154_s22  ;;  %s491_s12 = scalar_lea.vmem [#allocation2], %s1133_s28 }
  0x35   : > { %s499_s3 = sshll.u32 %s491_s12, 4  ;;  %s497_s7 = sshll.u32 %s496_s13, 4  ;;  %s500_s3 = int_to_ptr.vmem [resolvable:$true] %s499_s3  ;;  %s498_s7 = int_to_ptr.hbm [resolvable:$true] %s497_s7 }
  0x36   : > { %p1847_p7 = pnand %p1255_p2, %p1820_p11  ;;  %s488_s9 = scalar_lea.sflag [#allocation3], %s487_s25 }
  0x37   : > { %s1491_s11 = sshra.s32 %s498_s7, 4  ;;  %s1498_s13 = scalar_lea.hbm %s1980_s0, 64  ;;  %s1492_s11 = int_to_ptr.hbm [resolvable:$true] %s1491_s11 }
  0x38   : > { %s1493_s26 = scalar_lea.hbm %s1492_s11, 32  ;;  %p1495_p9 = pneg %p1847_p7 }
  0x39   : > { %p1494_p8 = scmp.ne.s32.totalorder %s1492_s11, %s1493_s26  ;;  %p1499_p11 = scmp.lt.s32.totalorder %s1492_s11, %s1980_s0 }
  0x3a   : > { %p1500_p0 = scmp.lt.s32.totalorder %s1498_s13, %s1493_s26 }
  0x3b   : > { %p1496_p10 = pnand %p1495_p9, %p1494_p8 }
  0x3c   : > { %p1501_p2 = por %p1500_p0, %p1499_p11 }
  0x3d   : > { %p1497_p13 = pneg %p1496_p10 }
  0x3f   : > { %p1502_p5 = pnand %p1501_p2, %p1497_p13 }
  0x41   : > { %1505 = shalt.err (!%p1502_p5)
}
  0x42   : > { %s2020_s25 = smov 8   ;;  %s2021_s1 = smov 128  }
  0x43   : > { %1241 = dma.hbm_to_vmem [thread:$0]  (!%p1847_p7), %s498_s7, 512, %s500_s3, %s488_s9, %s2021_s1, %s2021_s1, %s2020_s25  }
  0x44   : > { %511 = sbr.rel (%p1747_p3) target bundleno = 939 (0x3ab), region = 72  ;;  %s1867_s24 = sand.u32 (!%p1747_p3), 1, %s1623_s30  }
  0x45   : > { %s1870_s11 = sshll.u32 (!%p1747_p3), %s1867_s24, 5  ;;  %s514_s26 = scalar_lea.sflag (!%p1747_p3), [#allocation3], %s1867_s24 }
  0x46   : > { %s1874_s28 = scalar_lea.vmem (!%p1747_p3), [#allocation2], %s1870_s11 }
  0x49   : > { %1594 = dma.done.wait (%p1826_p12), %s514_s26, 512  }
  0x4a   : > { %1596 = vsyncadd (%p1826_p12), %s514_s26, 4294966784 }
  0x4b   : > { %1598 = dma.done.wait (%p58_p1), [#allocation6], 4096  }
  0x4c   : > { %1600 = vsyncadd (%p58_p1), [#allocation6], 4294963200 }
  0x4d   : > { %1602 = dma.done.wait (%p58_p1), [#allocation9], 4096  }
  0x4e   : > { %1604 = vsyncadd (%p58_p1), [#allocation9], 4294963200 }
  0x4f   : > { %1606 = dma.done.wait (%p58_p1), [#allocation12], 4096  }
  0x50   : > { %1608 = vsyncadd (%p58_p1), [#allocation12], 4294963200  ;;  %v620_v0 = vld [vmem:[#allocation5 + $0x78] sm:$0xff]  ;;  %v619_v1 = vld [vmem:[#allocation5 + $0x70] sm:$0xff]  ;;  %s1906_s12 = scalar_lea.vmem [#allocation15], %s1870_s11  ;;  %s1155_s26 = sshll.u32 %s1742_s20, 5 }
  0x51   : > { %625 = vmatpush.msra.mxu0 %v620_v0  ;;  %v618_v2 = vld [vmem:[#allocation5 + $0x68] sm:$0xff]  ;;  %v617_v3 = vld [vmem:[#allocation5 + $0x60] sm:$0xff]  ;;  %v616_v4 = vld [vmem:[#allocation5 + $0x58] sm:$0xff]  ;;  %s958_s1 = sshll.u32 %s1906_s12, 4  ;;  %s957_s7 = scalar_lea.hbm %s1994_s14, %s1155_s26  ;;  %s959_s1 = int_to_ptr.vmem [resolvable:$true] %s958_s1 }
  0x52   : > { %v615_v5 = vld [vmem:[#allocation5 + $0x50] sm:$0xff]  ;;  %v614_v6 = vld [vmem:[#allocation5 + $0x48] sm:$0xff]  ;;  %v613_v7 = vld [vmem:[#allocation5 + $0x40] sm:$0xff]  ;;  %s960_s9 = sshll.u32 %s957_s7, 4  ;;  %s929_s21 = scalar_lea.sflag [#allocation16], %s1867_s24  ;;  %s961_s9 = int_to_ptr.hbm [resolvable:$true] %s960_s9 }
  0x53   : > { %626 = vmatpush.msra.mxu0 %v619_v1  ;;  %v612_v8 = vld [vmem:[#allocation5 + $0x38] sm:$0xff]  ;;  %v611_v9 = vld [vmem:[#allocation5 + $0x30] sm:$0xff]  ;;  %v610_v10 = vld [vmem:[#allocation5 + $0x28] sm:$0xff]  ;;  %s1535_s18 = sshra.s32 %s961_s9, 4  ;;  %s1536_s18 = int_to_ptr.hbm [resolvable:$true] %s1535_s18 }
  0x54   : > { %v609_v11 = vld [vmem:[#allocation5 + $0x20] sm:$0xff]  ;;  %v608_v12 = vld [vmem:[#allocation5 + $0x18] sm:$0xff]  ;;  %v607_v13 = vld [vmem:[#allocation5 + $0x10] sm:$0xff]  ;;  %s1537_s19 = scalar_lea.hbm %s1536_s18, 32  ;;  %p1542_p12 = scmp.lt.s32.totalorder %s1536_s18, %s1994_s14 }
  0x55   : > { %627 = vmatpush.msra.mxu0 %v618_v2  ;;  %v673_v14 = vld [vmem:[#allocation7 + $0x78] sm:$0xff]  ;;  %v672_v15 = vld [vmem:[#allocation7 + $0x70] sm:$0xff]  ;;  %v606_v16 = vld [vmem:[#allocation5 + $0x8] sm:$0xff]  ;;  %p1538_p1 = scmp.ne.s32.totalorder %s1536_s18, %s1537_s19 }
  0x56   : > { %678 = vmatpush.msra.mxu1 %v673_v14  ;;  %v671_v17 = vld [vmem:[#allocation7 + $0x68] sm:$0xff]  ;;  %v605_v18 = vld [vmem:[#allocation5] sm:$0xff]  ;;  %v669_v21 = vld [vmem:[#allocation7 + $0x58] sm:$0xff] }
  0x57   : > { %628 = vmatpush.msra.mxu0 %v617_v3  ;;  %v670_v19 = vld [vmem:[#allocation7 + $0x60] sm:$0xff]  ;;  %v668_v22 = vld [vmem:[#allocation7 + $0x50] sm:$0xff]  ;;  %v667_v23 = vld [vmem:[#allocation7 + $0x48] sm:$0xff]  ;;  %p1539_p3 = pnand %p1538_p1, %p1833_p4 }
  0x58   : > { %679 = vmatpush.msra.mxu1 %v672_v15  ;;  %v601_v20 = vld [vmem:[%s1874_s28] sm:$0xff]  ;;  %v602_v25 = vld [vmem:[%s1874_s28 + $0x8] sm:$0xff]  ;;  %v665_v26 = vld [vmem:[#allocation7 + $0x38] sm:$0xff] }
  0x59   : > { %629 = vmatpush.msra.mxu0 %v616_v4  ;;  %v666_v24 = vld [vmem:[#allocation7 + $0x40] sm:$0xff]  ;;  %v664_v27 = vld [vmem:[#allocation7 + $0x30] sm:$0xff]  ;;  %v663_v28 = vld [vmem:[#allocation7 + $0x28] sm:$0xff]  ;;  %p1540_p5 = pneg %p1539_p3 }
  0x5a   : > { %680 = vmatpush.msra.mxu1 %v671_v17  ;;  %v662_v29 = vld [vmem:[#allocation7 + $0x20] sm:$0xff]  ;;  %v603_v30 = vld [vmem:[%s1874_s28 + $0x10] sm:$0xff]  ;;  %v661_v31 = vld [vmem:[#allocation7 + $0x18] sm:$0xff] }
  0x5b   : > { %630 = vmatpush.msra.mxu0 %v615_v5  ;;  %v604_v32 = vld [vmem:[%s1874_s28 + $0x18] sm:$0xff]  ;;  %v660_v33 = vld [vmem:[#allocation7 + $0x10] sm:$0xff]  ;;  %v659_v34 = vld [vmem:[#allocation7 + $0x8] sm:$0xff] }
  0x5c   : > { %681 = vmatpush.msra.mxu1 %v670_v19  ;;  %v658_v35 = vld [vmem:[#allocation7] sm:$0xff]  ;;  %v726_v37 = vld [vmem:[#allocation8 + $0x78] sm:$0xff]  ;;  %v725_v38 = vld [vmem:[#allocation8 + $0x70] sm:$0xff] }
  0x5d   : > { %631 = vmatpush.msra.mxu0 %v614_v6  ;;  %v1305_v36 = vld [vmem:[%s1982_s2] ss:$0 sm:$0xff]  ;;  %731 = vmatpush.msra.mxu2 %v726_v37  ;;  %v724_v39 = vld [vmem:[#allocation8 + $0x68] sm:$0xff]  ;;  %v722_v44 = vld [vmem:[#allocation8 + $0x58] sm:$0xff] }
  0x5e   : > { %682 = vmatpush.msra.mxu1 %v669_v21  ;;  %v723_v42 = vld [vmem:[#allocation8 + $0x60] sm:$0xff]  ;;  %v721_v45 = vld [vmem:[#allocation8 + $0x50] sm:$0xff]  ;;  %v720_v46 = vld [vmem:[#allocation8 + $0x48] sm:$0xff] }
  0x5f   : > { %632 = vmatpush.msra.mxu0 %v613_v7  ;;  %732 = vmatpush.msra.mxu2 %v725_v38  ;;  %v719_v49 = vld [vmem:[#allocation8 + $0x40] sm:$0xff]  ;;  %v718_v51 = vld [vmem:[#allocation8 + $0x38] sm:$0xff]  ;;  %v717_v52 = vld [vmem:[#allocation8 + $0x30] sm:$0xff] }
  0x60   : > { %683 = vmatpush.msra.mxu1 %v668_v22  ;;  %v716_v53 = vld [vmem:[#allocation8 + $0x28] sm:$0xff]  ;;  %v715_v56 = vld [vmem:[#allocation8 + $0x20] sm:$0xff]  ;;  %v714_v58 = vld [vmem:[#allocation8 + $0x18] sm:$0xff] }
  0x61   : > { %633 = vmatpush.msra.mxu0 %v612_v8  ;;  %733 = vmatpush.msra.mxu2 %v724_v39  ;;  %v713_v62 = vld [vmem:[#allocation8 + $0x10] sm:$0xff]  ;;  %v712_v63 = vld [vmem:[#allocation8 + $0x8] sm:$0xff]  ;;  %v711_v0 = vld [vmem:[#allocation8] sm:$0xff] }
  0x62   : > { %684 = vmatpush.msra.mxu1 %v667_v23  ;;  %v1306_v1 = vld [vmem:[%s1984_s4] ss:$0 sm:$0xff]  ;;  %v779_v2 = vld [vmem:[#allocation10 + $0x78] sm:$0xff]  ;;  %v778_v3 = vld [vmem:[#allocation10 + $0x70] sm:$0xff] }
  0x63   : > { %634 = vmatpush.msra.mxu0 %v611_v9  ;;  %734 = vmatpush.msra.mxu2 %v723_v42  ;;  %v777_v4 = vld [vmem:[#allocation10 + $0x68] sm:$0xff]  ;;  %v776_v7 = vld [vmem:[#allocation10 + $0x60] sm:$0xff]  ;;  %v775_v9 = vld [vmem:[#allocation10 + $0x58] sm:$0xff] }
  0x64   : > { %685 = vmatpush.msra.mxu1 %v666_v24  ;;  %784 = vmatpush.msra.mxu3 %v779_v2  ;;  %v772_v14 = vld [vmem:[#allocation10 + $0x40] sm:$0xff]  ;;  %v770_v17 = vld [vmem:[#allocation10 + $0x30] sm:$0xff]  ;;  %v767_v23 = vld [vmem:[#allocation10 + $0x18] sm:$0xff] }
  0x65   : > { %635 = vmatpush.msra.mxu0 %v610_v10  ;;  %735 = vmatpush.msra.mxu2 %v722_v44  ;;  %v774_v10 = vld [vmem:[#allocation10 + $0x50] sm:$0xff]  ;;  %v768_v21 = vld [vmem:[#allocation10 + $0x20] sm:$0xff]  ;;  %v828_v37 = vld [vmem:[#allocation11 + $0x58] sm:$0xff] }
  0x66   : > { %686 = vmatpush.msra.mxu1 %v665_v26  ;;  %785 = vmatpush.msra.mxu3 %v778_v3  ;;  %v766_v24 = vld [vmem:[#allocation10 + $0x10] sm:$0xff]  ;;  %v826_v39 = vld [vmem:[#allocation11 + $0x48] sm:$0xff] }
  0x67   : > { %636 = vmatpush.msra.mxu0 %v609_v11  ;;  %736 = vmatpush.msra.mxu2 %v721_v45  ;;  %v773_v11 = vld [vmem:[#allocation10 + $0x48] sm:$0xff]  ;;  %v827_v38 = vld [vmem:[#allocation11 + $0x50] sm:$0xff] }
  0x68   : > { %687 = vmatpush.msra.mxu1 %v664_v27  ;;  %786 = vmatpush.msra.mxu3 %v777_v4  ;;  %v823_v44 = vld [vmem:[#allocation11 + $0x30] sm:$0xff]  ;;  %v822_v45 = vld [vmem:[#allocation11 + $0x28] sm:$0xff]  ;;  %v878_v4 = vld [vmem:[#allocation13 + $0x40] sm:$0xff] }
  0x69   : > { %637 = vmatpush.msra.mxu0 %v608_v12  ;;  %737 = vmatpush.msra.mxu2 %v720_v46  ;;  %v821_v46 = vld [vmem:[#allocation11 + $0x20] sm:$0xff] }
  0x6a   : > { %688 = vmatpush.msra.mxu1 %v663_v28  ;;  %787 = vmatpush.msra.mxu3 %v776_v7  ;;  %v765_v28 = vld [vmem:[#allocation10 + $0x8] sm:$0xff]  ;;  %v876_v7 = vld [vmem:[#allocation13 + $0x30] sm:$0xff] }
  0x6b   : > { %638 = vmatpush.msra.mxu0 %v607_v13  ;;  %738 = vmatpush.msra.mxu2 %v719_v49  ;;  %v820_v49 = vld [vmem:[#allocation11 + $0x18] sm:$0xff] }
  0x6c   : > { %689 = vmatpush.msra.mxu1 %v662_v29  ;;  %788 = vmatpush.msra.mxu3 %v775_v9  ;;  %v764_v29 = vld [vmem:[#allocation10] sm:$0xff] }
  0x6d   : > { %639 = vmatpush.msra.mxu0 %v606_v16  ;;  %739 = vmatpush.msra.mxu2 %v718_v51  ;;  %v771_v16 = vld [vmem:[#allocation10 + $0x38] sm:$0xff] }
  0x6e   : > { %690 = vmatpush.msra.mxu1 %v661_v31  ;;  %789 = vmatpush.msra.mxu3 %v774_v10  ;;  %v831_v31 = vld [vmem:[#allocation11 + $0x70] sm:$0xff] }
  0x6f   : > { %640 = vmatpush.msra.mxu0 %v605_v18  ;;  %740 = vmatpush.msra.mxu2 %v717_v52  ;;  %v769_v18 = vld [vmem:[#allocation10 + $0x28] sm:$0xff]  ;;  %v819_v52 = vld [vmem:[#allocation11 + $0x10] sm:$0xff] }
  0x70   : > { %641 = vmatmul.f32.vlgmr.msra.gmra.mxu0 %v601_v20  ;;  %691 = vmatpush.msra.mxu1 %v660_v33  ;;  %v830_v33 = vld [vmem:[#allocation11 + $0x68] sm:$0xff] }
  0x71   : > { %741 = vmatpush.msra.mxu2 %v716_v53  ;;  %790 = vmatpush.msra.mxu3 %v773_v11  ;;  %v818_v53 = vld [vmem:[#allocation11 + $0x8] sm:$0xff]  ;;  %v874_v11 = vld [vmem:[#allocation13 + $0x20] sm:$0xff] }
  0x72   : > { %692 = vmatpush.msra.mxu1 %v659_v34  ;;  %v829_v34 = vld [vmem:[#allocation11 + $0x60] sm:$0xff] }
  0x73   : > { %742 = vmatpush.msra.mxu2 %v715_v56  ;;  %791 = vmatpush.msra.mxu3 %v772_v14  ;;  %v885_v56 = vld [vmem:[#allocation13 + $0x78] sm:$0xff] }
  0x74   : > { %693 = vmatpush.msra.mxu1 %v658_v35 }
  0x75   : > { %743 = vmatpush.msra.mxu2 %v714_v58  ;;  %792 = vmatpush.msra.mxu3 %v771_v16  ;;  %v883_v58 = vld [vmem:[#allocation13 + $0x68] sm:$0xff] }
  0x76   : > { %890 = vmatpush.msrb.mxu1 %v885_v56 }
  0x77   : > { %744 = vmatpush.msra.mxu2 %v713_v62  ;;  %793 = vmatpush.msra.mxu3 %v770_v17  ;;  %v872_v17 = vld [vmem:[#allocation13 + $0x10] sm:$0xff] }
  0x78   : > { %644 = vmatmul.f32.gmra.mxu0 %v602_v25 }
  0x79   : > { %745 = vmatpush.msra.mxu2 %v712_v63  ;;  %794 = vmatpush.msra.mxu3 %v769_v18  ;;  %v881_v63 = vld [vmem:[#allocation13 + $0x58] sm:$0xff]  ;;  %v871_v18 = vld [vmem:[#allocation13 + $0x8] sm:$0xff] }
  0x7b   : > { %746 = vmatpush.msra.mxu2 %v711_v0  ;;  %795 = vmatpush.msra.mxu3 %v768_v21  ;;  %v880_v0 = vld [vmem:[#allocation13 + $0x50] sm:$0xff] }
  0x7d   : > { %796 = vmatpush.msra.mxu3 %v767_v23 }
  0x7f   : > { %797 = vmatpush.msra.mxu3 %v766_v24 }
  0x80   : > { %647 = vmatmul.f32.gmra.mxu0 %v603_v30  ;;  %v832_v30 = vld [vmem:[#allocation11 + $0x78] sm:$0xff] }
  0x81   : > { %798 = vmatpush.msra.mxu3 %v765_v28  ;;  %837 = vmatpush.msrb.mxu0 %v832_v30 }
  0x82   : > { %1157 = vmatpush.msrb.mxu2 %v832_v30 }
  0x83   : > { %799 = vmatpush.msra.mxu3 %v764_v29  ;;  %838 = vmatpush.msrb.mxu0 %v831_v31 }
  0x84   : > { %1158 = vmatpush.msrb.mxu2 %v831_v31 }
  0x85   : > { %839 = vmatpush.msrb.mxu0 %v830_v33  ;;  %1173 = vmatpush.msrb.mxu3 %v885_v56 }
  0x86   : > { %1159 = vmatpush.msrb.mxu2 %v830_v33 }
  0x87   : > { %840 = vmatpush.msrb.mxu0 %v829_v34 }
  0x88   : > { %650 = vmatmul.f32.gmra.mxu0 %v604_v32  ;;  %v1307_v32 = vld [vmem:[%s1986_s6] ss:$0 sm:$0xff]  ;;  %1160 = vmatpush.msrb.mxu2 %v829_v34 }
  0x89   : > { %841 = vmatpush.msrb.mxu0 %v828_v37 }
  0x8a   : > { %1161 = vmatpush.msrb.mxu2 %v828_v37 }
  0x8b   : > { %842 = vmatpush.msrb.mxu0 %v827_v38 }
  0x8c   : > { %1162 = vmatpush.msrb.mxu2 %v827_v38 }
  0x8d   : > { %843 = vmatpush.msrb.mxu0 %v826_v39 }
  0x8e   : > { %1163 = vmatpush.msrb.mxu2 %v826_v39 }
  0xed   : > { %v642_v40 = vpop.f32.mrf.mxu0 }
  0xee   : > { %v643_v41 = vadd.f32 %v1305_v36, %v642_v40  ;;  %v825_v40 = vld [vmem:[#allocation11 + $0x40] sm:$0xff] }
  0xef   : > { %844 = vmatpush.msrb.mxu0 %v825_v40  ;;  %1164 = vmatpush.msrb.mxu2 %v825_v40 }
  0xf0   : > { %v654_v43 = vmax.f32 %v643_v41, 0.0 }
  0xf2   : > { %694 = vmatmul.f32.vlgmr.msra.gmra.mxu1 %v654_v43  ;;  %v824_v43 = vld [vmem:[#allocation11 + $0x38] sm:$0xff] }
  0xf3   : > { %845 = vmatpush.msrb.mxu0 %v824_v43  ;;  %1165 = vmatpush.msrb.mxu2 %v824_v43 }
  0xf5   : > { %v645_v47 = vpop.f32.mrf.mxu0  ;;  %846 = vmatpush.msrb.mxu0 %v823_v44  ;;  %1166 = vmatpush.msrb.mxu2 %v823_v44 }
  0xf6   : > { %v646_v48 = vadd.f32 %v1305_v36, %v645_v47 }
  0xf7   : > { %847 = vmatpush.msrb.mxu0 %v822_v45  ;;  %1167 = vmatpush.msrb.mxu2 %v822_v45 }
  0xf8   : > { %v655_v50 = vmax.f32 %v646_v48, 0.0 }
  0xf9   : > { %848 = vmatpush.msrb.mxu0 %v821_v46  ;;  %1168 = vmatpush.msrb.mxu2 %v821_v46 }
  0xfa   : > { %697 = vmatmul.f32.gmra.mxu1 %v655_v50 }
  0xfb   : > { %849 = vmatpush.msrb.mxu0 %v820_v49  ;;  %1169 = vmatpush.msrb.mxu2 %v820_v49 }
  0xfd   : > { %v648_v54 = vpop.f32.mrf.mxu0  ;;  %850 = vmatpush.msrb.mxu0 %v819_v52  ;;  %1170 = vmatpush.msrb.mxu2 %v819_v52 }
  0xfe   : > { %v649_v55 = vadd.f32 %v1305_v36, %v648_v54  ;;  %v817_v54 = vld [vmem:[#allocation11] sm:$0xff] }
  0xff   : > { %851 = vmatpush.msrb.mxu0 %v818_v53  ;;  %1171 = vmatpush.msrb.mxu2 %v818_v53 }
 0x100   : > { %v656_v57 = vmax.f32 %v649_v55, 0.0  ;;  %v1308_v55 = vld [vmem:[%s1988_s8] ss:$0 sm:$0xff] }
 0x101   : > { %852 = vmatpush.msrb.mxu0 %v817_v54  ;;  %1172 = vmatpush.msrb.mxu2 %v817_v54 }
 0x102   : > { %700 = vmatmul.f32.gmra.mxu1 %v656_v57  ;;  %v884_v57 = vld [vmem:[#allocation13 + $0x70] sm:$0xff] }
 0x103   : > { %891 = vmatpush.msrb.mxu1 %v884_v57  ;;  %1174 = vmatpush.msrb.mxu3 %v884_v57 }
 0x105   : > { %v651_v59 = vpop.f32.mrf.mxu0  ;;  %892 = vmatpush.msrb.mxu1 %v883_v58  ;;  %1175 = vmatpush.msrb.mxu3 %v883_v58 }
 0x106   : > { %v652_v60 = vadd.f32 %v1305_v36, %v651_v59 }
 0x108   : > { %v657_v61 = vmax.f32 %v652_v60, 0.0 }
 0x10a   : > { %703 = vmatmul.f32.gmra.mxu1 %v657_v61  ;;  %v882_v61 = vld [vmem:[#allocation13 + $0x60] sm:$0xff] }
 0x10b   : > { %893 = vmatpush.msrb.mxu1 %v882_v61  ;;  %1176 = vmatpush.msrb.mxu3 %v882_v61 }
 0x10d   : > { %894 = vmatpush.msrb.mxu1 %v881_v63  ;;  %1177 = vmatpush.msrb.mxu3 %v881_v63 }
 0x10f   : > { %895 = vmatpush.msrb.mxu1 %v880_v0  ;;  %1178 = vmatpush.msrb.mxu3 %v880_v0 }
 0x16f   : > { %v695_v5 = vpop.f32.mrf.mxu1 }
 0x170   : > { %v696_v6 = vadd.f32 %v1306_v1, %v695_v5 }
 0x172   : > { %v707_v8 = vmax.f32 %v696_v6, 0.0  ;;  %v877_v6 = vld [vmem:[#allocation13 + $0x38] sm:$0xff] }
 0x174   : > { %747 = vmatmul.f32.vlgmr.msra.gmra.mxu2 %v707_v8  ;;  %v875_v8 = vld [vmem:[#allocation13 + $0x28] sm:$0xff] }
 0x177   : > { %v698_v12 = vpop.f32.mrf.mxu1 }
 0x178   : > { %v699_v13 = vadd.f32 %v1306_v1, %v698_v12 }
 0x17a   : > { %v708_v15 = vmax.f32 %v699_v13, 0.0  ;;  %v873_v13 = vld [vmem:[#allocation13 + $0x18] sm:$0xff] }
 0x17c   : > { %750 = vmatmul.f32.gmra.mxu2 %v708_v15 }
 0x17f   : > { %v701_v19 = vpop.f32.mrf.mxu1 }
 0x180   : > { %v702_v20 = vadd.f32 %v1306_v1, %v701_v19  ;;  %v870_v19 = vld [vmem:[#allocation13] sm:$0xff] }
 0x182   : > { %v709_v22 = vmax.f32 %v702_v20, 0.0  ;;  %v1309_v20 = vld [vmem:[%s1990_s10] ss:$0 sm:$0xff] }
 0x184   : > { %753 = vmatmul.f32.gmra.mxu2 %v709_v22 }
 0x187   : > { %v704_v25 = vpop.f32.mrf.mxu1 }
 0x188   : > { %v705_v26 = vadd.f32 %v1306_v1, %v704_v25  ;;  %v879_v1 = vld [vmem:[#allocation13 + $0x48] sm:$0xff] }
 0x189   : > { %896 = vmatpush.msrb.mxu1 %v879_v1  ;;  %1179 = vmatpush.msrb.mxu3 %v879_v1 }
 0x18a   : > { %v710_v27 = vmax.f32 %v705_v26, 0.0 }
 0x18b   : > { %897 = vmatpush.msrb.mxu1 %v878_v4  ;;  %1180 = vmatpush.msrb.mxu3 %v878_v4 }
 0x18c   : > { %756 = vmatmul.f32.gmra.mxu2 %v710_v27 }
 0x18d   : > { %898 = vmatpush.msrb.mxu1 %v877_v6  ;;  %1181 = vmatpush.msrb.mxu3 %v877_v6 }
 0x18f   : > { %899 = vmatpush.msrb.mxu1 %v876_v7  ;;  %1182 = vmatpush.msrb.mxu3 %v876_v7 }
 0x191   : > { %900 = vmatpush.msrb.mxu1 %v875_v8  ;;  %1183 = vmatpush.msrb.mxu3 %v875_v8 }
 0x193   : > { %901 = vmatpush.msrb.mxu1 %v874_v11  ;;  %1184 = vmatpush.msrb.mxu3 %v874_v11 }
 0x195   : > { %902 = vmatpush.msrb.mxu1 %v873_v13  ;;  %1185 = vmatpush.msrb.mxu3 %v873_v13 }
 0x197   : > { %903 = vmatpush.msrb.mxu1 %v872_v17  ;;  %1186 = vmatpush.msrb.mxu3 %v872_v17 }
 0x199   : > { %904 = vmatpush.msrb.mxu1 %v871_v18  ;;  %1187 = vmatpush.msrb.mxu3 %v871_v18 }
 0x19b   : > { %905 = vmatpush.msrb.mxu1 %v870_v19  ;;  %1188 = vmatpush.msrb.mxu3 %v870_v19 }
 0x1f7   : > { %v748_v35 = vpop.f32.mrf.mxu2 }
 0x1f8   : > { %v749_v36 = vadd.f32 %v1307_v32, %v748_v35 }
 0x1fa   : > { %760 = vst [vmem:[%s1906_s12] sm:$0xff] %v749_v36  ;;  %800 = vmatmul.f32.vlgmr.msra.gmra.mxu3 %v749_v36 }
 0x1ff   : > { %v751_v41 = vpop.f32.mrf.mxu2 }
 0x200   : > { %v752_v42 = vadd.f32 %v1307_v32, %v751_v41 }
 0x202   : > { %761 = vst [vmem:[%s1906_s12 + $0x8] sm:$0xff] %v752_v42  ;;  %803 = vmatmul.f32.gmra.mxu3 %v752_v42 }
 0x207   : > { %v754_v47 = vpop.f32.mrf.mxu2 }
 0x208   : > { %v755_v48 = vadd.f32 %v1307_v32, %v754_v47 }
 0x20a   : > { %762 = vst [vmem:[%s1906_s12 + $0x10] sm:$0xff] %v755_v48  ;;  %806 = vmatmul.f32.gmra.mxu3 %v755_v48 }
 0x20f   : > { %v757_v50 = vpop.f32.mrf.mxu2 }
 0x210   : > { %v758_v51 = vadd.f32 %v1307_v32, %v757_v50 }
 0x212   : > { %763 = vst [vmem:[%s1906_s12 + $0x18] sm:$0xff] %v758_v51  ;;  %809 = vmatmul.f32.gmra.mxu3 %v758_v51  ;;  %s1541_s12 = scalar_lea.hbm %s1994_s14, 64 }
 0x213   : > { %p1543_p7 = scmp.lt.s32.totalorder %s1541_s12, %s1537_s19 }
 0x215   : > { %p1544_p8 = por %p1543_p7, %p1542_p12 }
 0x217   : > { %p1545_p9 = pnand %p1544_p8, %p1540_p5 }
 0x27d   : > { %v801_v59 = vpop.f32.mrf.mxu3 }
 0x27e   : > { %v802_v60 = vadd.f32 %v1308_v55, %v801_v59 }
 0x280   : > { %v813_v62 = vmax.f32 %v802_v60, 0.0 }
 0x282   : > { %853 = vmatmul.f32.vlgmr.msrb.gmra.mxu0 %v813_v62 }
 0x285   : > { %v804_v2 = vpop.f32.mrf.mxu3 }
 0x286   : > { %v805_v3 = vadd.f32 %v1308_v55, %v804_v2 }
 0x288   : > { %v814_v5 = vmax.f32 %v805_v3, 0.0 }
 0x28a   : > { %856 = vmatmul.f32.gmra.mxu0 %v814_v5 }
 0x28d   : > { %v807_v9 = vpop.f32.mrf.mxu3 }
 0x28e   : > { %v808_v10 = vadd.f32 %v1308_v55, %v807_v9 }
 0x290   : > { %v815_v12 = vmax.f32 %v808_v10, 0.0 }
 0x292   : > { %859 = vmatmul.f32.vlgmr.msrb.gmra.mxu2 %v815_v12 }
 0x295   : > { %v810_v14 = vpop.f32.mrf.mxu3 }
 0x296   : > { %v811_v15 = vadd.f32 %v1308_v55, %v810_v14 }
 0x298   : > { %v816_v16 = vmax.f32 %v811_v15, 0.0 }
 0x29a   : > { %862 = vmatmul.f32.gmra.mxu2 %v816_v16 }
 0x2ff   : > { %v854_v21 = vpop.f32.mrf.mxu0 }
 0x300   : > { %v855_v22 = vadd.f32 %v1309_v20, %v854_v21 }
 0x302   : > { %v866_v23 = vmax.f32 %v855_v22, 0.0 }
 0x304   : > { %906 = vmatmul.f32.vlgmr.msrb.gmra.mxu1 %v866_v23 }
 0x307   : > { %v857_v24 = vpop.f32.mrf.mxu0 }
 0x308   : > { %v858_v25 = vadd.f32 %v1309_v20, %v857_v24 }
 0x30a   : > { %v867_v26 = vmax.f32 %v858_v25, 0.0 }
 0x30c   : > { %909 = vmatmul.f32.gmra.mxu1 %v867_v26 }
 0x315   : > { %v860_v27 = vpop.f32.mrf.mxu2 }
 0x316   : > { %v861_v28 = vadd.f32 %v1309_v20, %v860_v27 }
 0x318   : > { %v868_v29 = vmax.f32 %v861_v28, 0.0 }
 0x31a   : > { %912 = vmatmul.f32.vlgmr.msrb.gmra.mxu3 %v868_v29 }
 0x31d   : > { %v863_v30 = vpop.f32.mrf.mxu2 }
 0x31e   : > { %v864_v31 = vadd.f32 %v1309_v20, %v863_v30 }
 0x320   : > { %v869_v32 = vmax.f32 %v864_v31, 0.0 }
 0x322   : > { %915 = vmatmul.f32.gmra.mxu3 %v869_v32 }
 0x323   : > { %1548 = shalt.err (!%p1545_p9)
}
 0x324   : > { %s1641_s28 = smov 128   ;;  %s1642_s3 = smov 8  }
 0x325   : > { %1216 = dma.vmem_to_hbm [thread:$0]  (%p1833_p4), %s959_s1, 512, %s961_s9, %s929_s21, %s1641_s28, %s1641_s28, %s1642_s3  }
 0x326   : > { %s2022_s22 = sld [smem:[#allocation30_spill]]  ;;  %s590_s18 = scalar_lea.vmem [#allocation14], %s1870_s11 }
 0x327   : > { %s2023_s1 = sld [smem:[#allocation31_spill]]  ;;  %s941_s21 = sshll.u32 %s590_s18, 4  ;;  %s942_s21 = int_to_ptr.vmem [resolvable:$true] %s941_s21 }
 0x328   : > { %s924_s11 = scalar_lea.sflag [#allocation4], %s1867_s24 }
 0x32c   : > { %v1310_v33 = vld [vmem:[%s2022_s22] ss:$0 sm:$0xff] }
 0x32d   : > { %s940_s9 = scalar_lea.hbm %s2023_s1, %s1155_s26  ;;  %s1569_s22 = scalar_lea.hbm %s2023_s1, 64 }
 0x32e   : > { %s943_s27 = sshll.u32 %s940_s9, 4  ;;  %s944_s27 = int_to_ptr.hbm [resolvable:$true] %s943_s27 }
 0x32f   : > { %s1563_s25 = sshra.s32 %s944_s27, 4  ;;  %s1564_s25 = int_to_ptr.hbm [resolvable:$true] %s1563_s25 }
 0x330   : > { %s1565_s7 = scalar_lea.hbm %s1564_s25, 32  ;;  %p1570_p0 = scmp.lt.s32.totalorder %s1564_s25, %s2023_s1 }
 0x331   : > { %p1566_p10 = scmp.ne.s32.totalorder %s1564_s25, %s1565_s7  ;;  %p1571_p2 = scmp.lt.s32.totalorder %s1569_s22, %s1565_s7 }
 0x333   : > { %p1567_p13 = pnand %p1566_p10, %p1833_p4  ;;  %p1572_p1 = por %p1571_p2, %p1570_p0 }
 0x335   : > { %p1568_p11 = pneg %p1567_p13 }
 0x337   : > { %p1573_p3 = pnand %p1572_p1, %p1568_p11 }
 0x381   : > { %v907_v34 = vpop.f32.mrf.mxu1 }
 0x382   : > { %v908_v35 = vadd.f32 %v1310_v33, %v907_v34 }
 0x384   : > { %919 = vst [vmem:[%s590_s18] sm:$0xff] %v908_v35 }
 0x389   : > { %v910_v36 = vpop.f32.mrf.mxu1 }
 0x38a   : > { %v911_v37 = vadd.f32 %v1310_v33, %v910_v36 }
 0x38c   : > { %920 = vst [vmem:[%s590_s18 + $0x8] sm:$0xff] %v911_v37 }
 0x39d   : > { %v913_v38 = vpop.f32.mrf.mxu3 }
 0x39e   : > { %v914_v39 = vadd.f32 %v1310_v33, %v913_v38 }
 0x3a0   : > { %921 = vst [vmem:[%s590_s18 + $0x10] sm:$0xff] %v914_v39 }
 0x3a5   : > { %v916_v40 = vpop.f32.mrf.mxu3 }
 0x3a6   : > { %v917_v41 = vadd.f32 %v1310_v33, %v916_v40 }
 0x3a8   : > { %922 = vst [vmem:[%s590_s18 + $0x18] sm:$0xff] %v917_v41 }
 0x3a9   : > { %1576 = shalt.err (!%p1573_p3)
}
 0x3aa   : > { %1215 = dma.vmem_to_hbm [thread:$0]  (%p1833_p4), %s942_s21, 512, %s944_s27, %s924_s11, %s1641_s28, %s1641_s28, %s1642_s3  }
 0x3ab PF: > { %s975_s24 = sand.u32 1, %s1619_s29   ;;  %p2024_p5 = scmp.ge.s32.totalorder %s1631_s16, 2 }
 0x3ac   : > { %s976_s18 = scalar_lea.sflag [#allocation4], %s975_s24 }
 0x3ad   : > { %p1243_p12 = pnand %p2024_p5, %p1837_p6 }
 0x3af   : > { %p1244_p7 = pneg %p1243_p12 }
 0x3b1   : > { %1610 = dma.done.wait (%p1244_p7), %s976_s18, 512  }
 0x3b2   : > { %1612 = vsyncadd (%p1244_p7), %s976_s18, 4294966784  ;;  %s986_s12 = scalar_lea.sflag [#allocation16], %s975_s24 }
 0x3b3   : > { %1614 = dma.done.wait (%p1244_p7), %s986_s12, 512  }
 0x3b4   : > { %1616 = vsyncadd (%p1244_p7), %s986_s12, 4294966784  ;;  %s2025_s17 = sld [smem:[#allocation23_spill]]  ;;  %p34_p4 = scmp.ge.s32.totalorder %s1807_s23, 4  }
 0x3b5   : > { %s2026_s29 = smov %s1623_s30  ;;  %s2027_s30 = smov %s1627_s15 }
 0x3b6   : > { %s2029_s16 = smov %s1807_s23  ;;  %36 = sbr.rel (!%p34_p4) target bundleno = 19 (0x13), region = 158 }
 0x3ba   : > { %s2028_s15 = smov %s2025_s17 }
 0x3bb   :  { %992 = vsyncpa [#allocation3], 1 }
 0x3bc   :  { %994 = vsyncpa [#allocation3 + $0x1], 1 }
 0x3bd   :  { %995 = vsyncpa [#allocation6], 1 }
 0x3be   :  { %996 = vsyncpa [#allocation9], 1 }
 0x3bf   :  { %997 = vsyncpa [#allocation12], 1 }
 0x3c0   :  { %998 = vsyncpa [#allocation4], 1 }
 0x3c1   :  { %1000 = vsyncpa [#allocation4 + $0x1], 1 }
 0x3c2   :  { %1001 = vsyncpa [#allocation16], 1 }
 0x3c3   :  { %1003 = vsyncpa [#allocation16 + $0x1], 1 }

</bundles_post_ra>
